<compile_context>
chip_gen: v7x
topology: tpu7x:2x2x1
jax: 0.10.0
libtpu: 0.0.40
codegen_flags: <defaults>
</compile_context>

<pallas_src>
import jax
import jax.numpy as jnp
import numpy as np
from jax.experimental import pallas as pl
from jax.experimental.pallas import tpu as pltpu


LANE = 128  # lane-dense padded output channel width


def _round_up(x, m):
    return (x + m - 1) // m * m


def _cparams():
    return pltpu.CompilerParams(
        dimension_semantics=("parallel",),
        vmem_limit_bytes=32 * 1024 * 1024,
    )


# ----------------------------------------------------------------------------
# Pallas kernels
# ----------------------------------------------------------------------------

def _conv_relu_pool_kernel(p_ref, w_ref, b_ref, o_ref):
    """Fused conv-as-matmul + 2x2 max-pool + bias + ReLU.

    p_ref: (4, TM, P)  im2col patches; axis 0 = pool-window position
    w_ref: (P, 128)    flattened conv weights, Cout zero-padded to 128
    b_ref: (1, 128)    conv bias, zero-padded
    o_ref: (TM, 128)   pooled output rows (lane-dense)
    """
    four, tm, pp = p_ref.shape
    # Leading-dim collapse: TM is a multiple of 8, so this reshape is
    # layout-preserving (no sublane repacking) -> one big lane-dense matmul.
    pts = p_ref[...].reshape(four * tm, pp)
    z = jnp.dot(pts, w_ref[...], preferred_element_type=jnp.float32)  # (4*TM, 128)
    # MaxPool2d(2): elementwise max of the 4 sublane-aligned row slabs.
    m = jnp.maximum(jnp.maximum(z[0 * tm:1 * tm], z[1 * tm:2 * tm]),
                    jnp.maximum(z[2 * tm:3 * tm], z[3 * tm:4 * tm]))
    # Bias + ReLU hoisted out of the window reduction (bias shared, ReLU monotone).
    o_ref[...] = jnp.maximum(m + b_ref[...], 0.0)


def _fc_kernel(x_ref, w_ref, b_ref, o_ref):
    """Folded Linear(320,50)->Linear(50,10) as a single matmul (out padded to 128)."""
    o_ref[...] = (
        jnp.dot(x_ref[...], w_ref[...], preferred_element_type=jnp.float32)
        + b_ref[...]
    )


# ----------------------------------------------------------------------------
# Host-side data rearrangement (pure layout work, single transpose).
# ----------------------------------------------------------------------------

def _patches_pooled(x_nchw, K, p_pad):
    """(B,C,H,W) -> (4, B*PH*PW, p_pad); window-major, features in (c,ky,kx) order."""
    B, C, H, W = x_nchw.shape
    OH, OW = H - K + 1, W - K + 1
    PH, PW = OH // 2, OW // 2
    cols = [x_nchw[:, :, ky:ky + OH, kx:kx + OW] for ky in range(K) for kx in range(K)]
    p = jnp.stack(cols, axis=-1)                      # (B, C, OH, OW, K*K)
    p = p.reshape(B, C, PH, 2, PW, 2, K * K)
    p = jnp.transpose(p, (3, 5, 0, 2, 4, 1, 6))       # (dy, dx, B, PH, PW, C, KK)
    p = p.reshape(4, B * PH * PW, C * K * K)
    P = C * K * K
    if p_pad > P:
        p = jnp.pad(p, ((0, 0), (0, 0), (0, p_pad - P)))
    return p, (B, PH, PW)


# ----------------------------------------------------------------------------
# Stage wrappers
# ----------------------------------------------------------------------------

def conv_relu_pool(x_nchw, wmat, bmat, K, cout, *, tm=512):
    """Conv2d(K) + ReLU + MaxPool2d(2) via a gridded Pallas kernel.  NCHW in/out."""
    p_pad = wmat.shape[0]
    cp = wmat.shape[1]                                # 128
    patches, (B, PH, PW) = _patches_pooled(x_nchw, K, p_pad)
    M = patches.shape[1]

    TM = min(tm, _round_up(M, 8))
    M_pad = _round_up(M, TM)
    if M_pad > M:
        patches = jnp.pad(patches, ((0, 0), (0, M_pad - M), (0, 0)))

    out = pl.pallas_call(
        _conv_relu_pool_kernel,
        out_shape=jax.ShapeDtypeStruct((M_pad, cp), jnp.float32),
        grid=(M_pad // TM,),
        in_specs=[
            pl.BlockSpec((4, TM, p_pad), lambda i: (0, i, 0)),   # patch stream (pipelined)
            pl.BlockSpec((p_pad, cp), lambda i: (0, 0)),         # weights: VMEM-resident
            pl.BlockSpec((1, cp), lambda i: (0, 0)),             # bias: VMEM-resident
        ],
        out_specs=pl.BlockSpec((TM, cp), lambda i: (i, 0)),
        compiler_params=_cparams(),
    )(patches, wmat, bmat)

    out = out[:M, :cout].reshape(B, PH, PW, cout)
    return jnp.transpose(out, (0, 3, 1, 2))                      # back to NCHW


def fc_forward(x_flat, w_eff, b_eff, num_out, *, tb=512):
    B, F = x_flat.shape
    cp = w_eff.shape[1]
    TB = min(tb, _round_up(B, 8))
    B_pad = _round_up(B, TB)
    if B_pad > B:
        x_flat = jnp.pad(x_flat, ((0, B_pad - B), (0, 0)))

    out = pl.pallas_call(
        _fc_kernel,
        out_shape=jax.ShapeDtypeStruct((B_pad, cp), jnp.float32),
        grid=(B_pad // TB,),
        in_specs=[
            pl.BlockSpec((TB, F), lambda i: (i, 0)),
            pl.BlockSpec((F, cp), lambda i: (0, 0)),
            pl.BlockSpec((1, cp), lambda i: (0, 0)),
        ],
        out_specs=pl.BlockSpec((TB, cp), lambda i: (i, 0)),
        compiler_params=_cparams(),
    )(x_flat, w_eff, b_eff)
    return out[:B, :num_out]


def net_forward(x, prep):
    """Forward pass equivalent to Net.forward (CrossEntropyLoss branch: raw logits)."""
    h = conv_relu_pool(x, prep["cw1"], prep["cb1"], K=5, cout=10)   # (B, 10, 12, 12)
    h = conv_relu_pool(h, prep["cw2"], prep["cb2"], K=5, cout=20)   # (B, 20, 4, 4)
    h = h.reshape(x.shape[0], -1)                                   # (B, 320), NCHW flatten
    return fc_forward(h, prep["fw"], prep["fb"], num_out=10)        # (B, 10)


# ----------------------------------------------------------------------------
# Parameter prep: reshape/pad conv weights, fold the two Linears (done once,
# outside the jitted hot path).
# ----------------------------------------------------------------------------

def _pad_axis(x, target, axis):
    pad = target - x.shape[axis]
    if pad <= 0:
        return x
    cfg = [(0, 0)] * x.ndim
    cfg[axis] = (0, pad)
    return jnp.pad(x, cfg)


def prepare_params(p):
    # conv1: (10,1,5,5) -> (25,10) -> pad K to 32, Cout to 128
    cw1 = p["cw1"].reshape(10, 25).T
    cw1 = _pad_axis(_pad_axis(cw1, 32, 0), LANE, 1)
    cb1 = _pad_axis(p["cb1"].reshape(1, 10), LANE, 1)
    # conv2: (20,10,5,5) -> (250,20) -> pad K to 256, Cout to 128
    cw2 = p["cw2"].reshape(20, 250).T
    cw2 = _pad_axis(_pad_axis(cw2, 256, 0), LANE, 1)
    cb2 = _pad_axis(p["cb2"].reshape(1, 20), LANE, 1)
    # Fold Linear(320,50)->Linear(50,10):  y = x @ (W1^T W2^T) + (b1 W2^T + b2)
    w_eff = p["fw1"].T @ p["fw2"].T                   # (320, 10)
    b_eff = p["fb1"] @ p["fw2"].T + p["fb2"]          # (10,)
    w_eff = _pad_axis(w_eff, LANE, 1)
    b_eff = _pad_axis(b_eff.reshape(1, 10), LANE, 1)
    return dict(cw1=cw1, cb1=cb1, cw2=cw2, cb2=cb2, fw=w_eff, fb=b_eff)


# ----------------------------------------------------------------------------
# Deterministic parameter init (same shapes as the PyTorch module).
# ----------------------------------------------------------------------------

def init_params(key):
    ks = jax.random.split(key, 8)
    s = 0.1
    return dict(
        cw1=jax.random.normal(ks[0], (10, 1, 5, 5), jnp.float32) * s,
        cb1=jax.random.normal(ks[1], (10,), jnp.float32) * s,
        cw2=jax.random.normal(ks[2], (20, 10, 5, 5), jnp.float32) * s,
        cb2=jax.random.normal(ks[3], (20,), jnp.float32) * s,
        fw1=jax.random.normal(ks[4], (50, 320), jnp.float32) * s,
        fb1=jax.random.normal(ks[5], (50,), jnp.float32) * s,
        fw2=jax.random.normal(ks[6], (10, 50), jnp.float32) * s,
        fb2=jax.random.normal(ks[7], (10,), jnp.float32) * s,
    )


# ----------------------------------------------------------------------------
# Pure-NumPy reference (float64) for a correctness sanity check.
# ----------------------------------------------------------------------------

def ref_forward(x, p):
    def conv(x, w, b):
        B, Cin, H, W = x.shape
        Cout, _, K, _ = w.shape
        OH, OW = H - K + 1, W - K + 1
        out = np.zeros((B, Cout, OH, OW), x.dtype)
        for ky in range(K):
            for kx in range(K):
                out += np.einsum("bchw,oc->bohw",
                                 x[:, :, ky:ky + OH, kx:kx + OW], w[:, :, ky, kx])
        return out + b[None, :, None, None]

    def pool2(x):
        B, C, H, W = x.shape
        return x.reshape(B, C, H // 2, 2, W // 2, 2).max(axis=(3, 5))

    h = pool2(np.maximum(conv(x, p["cw1"], p["cb1"]), 0.0))
    h = pool2(np.maximum(conv(h, p["cw2"], p["cb2"]), 0.0))
    h = h.reshape(x.shape[0], -1)
    h = h @ p["fw1"].T + p["fb1"]
    return h @ p["fw2"].T + p["fb2"]


if __name__ == "__main__":
    key = jax.random.PRNGKey(0)
    pkey, xkey = jax.random.split(key)
    params = init_params(pkey)
    prep = prepare_params(params)
    # MNIST-shaped input (28x28 is required by the Linear(320, 50) flatten), small batch.
    x = jax.random.normal(xkey, (2, 1, 28, 28), jnp.float32)

    out = jax.jit(net_forward)(x, prep)
    out = jax.block_until_ready(out)

    assert out.shape == (2, 10) and out.dtype == jnp.float32
    ref = ref_forward(np.asarray(x, np.float64),
                      {k: np.asarray(v, np.float64) for k, v in params.items()})
    np.testing.assert_allclose(np.asarray(out, np.float64), ref, rtol=5e-2, atol=5e-2)

    print("KERNEL_OK")
</pallas_src>

<mosaic_0001>
module attributes {stable_mosaic.version = 11 : i64} {
  func.func @_conv_relu_pool_kernel(%arg0: i32, %arg1: memref<4x288x32xf32, #tpu.memory_space<vmem>>, %arg2: memref<32x128xf32, #tpu.memory_space<vmem>>, %arg3: memref<1x128xf32, #tpu.memory_space<vmem>>, %arg4: memref<288x128xf32, #tpu.memory_space<vmem>>) attributes {dimension_semantics = [#tpu.dimension_semantics<parallel>], iteration_bounds = array<i64: 1>, scalar_prefetch = 0 : i64, scratch_operands = 0 : i64, tpu.core_type = #tpu.core_type<tc>, window_params = [{transform_indices = @transform_0, window_bounds = array<i64: 4, 288, 32>}, {pipeline_mode = #tpu.pipeline_mode<synchronous>, transform_indices = @transform_1, window_bounds = array<i64: 32, 128>}, {pipeline_mode = #tpu.pipeline_mode<synchronous>, transform_indices = @transform_2, window_bounds = array<i64: 1, 128>}, {transform_indices = @transform_3, window_bounds = array<i64: 288, 128>}]} {
    %c0 = arith.constant 0 : index
    %c0_0 = arith.constant 0 : index
    %c0_1 = arith.constant 0 : index
    %0 = vector.load %arg1[%c0, %c0_0, %c0_1] : memref<4x288x32xf32, #tpu.memory_space<vmem>>, vector<4x288x32xf32>
    %1 = vector.shape_cast %0 : vector<4x288x32xf32> to vector<1152x32xf32>
    %c0_2 = arith.constant 0 : index
    %c0_3 = arith.constant 0 : index
    %2 = vector.load %arg2[%c0_2, %c0_3] : memref<32x128xf32, #tpu.memory_space<vmem>>, vector<32x128xf32>
    %cst = arith.constant dense<0.000000e+00> : vector<1152x128xf32>
    %3 = tpu.matmul %1, %2, %cst {dimension_numbers = #tpu.dot_dimension_numbers<[1], [0], [0], [1], [0, 0, 1, 1], [], []>} : vector<1152x32xf32>, vector<32x128xf32>, vector<1152x128xf32> -> vector<1152x128xf32>
    %4 = vector.extract_strided_slice %3 {offsets = [0, 0], sizes = [288, 128], strides = [1, 1]} : vector<1152x128xf32> to vector<288x128xf32>
    %5 = vector.extract_strided_slice %3 {offsets = [288, 0], sizes = [288, 128], strides = [1, 1]} : vector<1152x128xf32> to vector<288x128xf32>
    %6 = arith.maximumf %4, %5 : vector<288x128xf32>
    %7 = vector.extract_strided_slice %3 {offsets = [576, 0], sizes = [288, 128], strides = [1, 1]} : vector<1152x128xf32> to vector<288x128xf32>
    %8 = vector.extract_strided_slice %3 {offsets = [864, 0], sizes = [288, 128], strides = [1, 1]} : vector<1152x128xf32> to vector<288x128xf32>
    %9 = arith.maximumf %7, %8 : vector<288x128xf32>
    %10 = arith.maximumf %6, %9 : vector<288x128xf32>
    %c0_4 = arith.constant 0 : index
    %c0_5 = arith.constant 0 : index
    %11 = vector.load %arg3[%c0_4, %c0_5] : memref<1x128xf32, #tpu.memory_space<vmem>>, vector<1x128xf32>
    %12 = vector.broadcast %11 : vector<1x128xf32> to vector<288x128xf32>
    %13 = arith.addf %10, %12 : vector<288x128xf32>
    %cst_6 = arith.constant 0.000000e+00 : f32
    %14 = vector.broadcast %cst_6 : f32 to vector<288x128xf32>
    %15 = arith.maximumf %13, %14 : vector<288x128xf32>
    %c0_7 = arith.constant 0 : index
    %c0_8 = arith.constant 0 : index
    %16 = vector.load %arg4[%c0_7, %c0_8] : memref<288x128xf32, #tpu.memory_space<vmem>>, vector<288x128xf32>
    tpu.vector_store %arg4[%c0_7, %c0_8], %15 {strides = array<i32>} : memref<288x128xf32, #tpu.memory_space<vmem>>, vector<288x128xf32>,
    return
  }
  func.func @transform_0(%arg0: i32) -> (i32, i32, i32) {
    %c0_i32 = arith.constant 0 : i32
    %c0_i32_0 = arith.constant 0 : i32
    %c0_i32_1 = arith.constant 0 : i32
    return %c0_i32, %arg0, %c0_i32_0 : i32, i32, i32
  }
  func.func @transform_1(%arg0: i32) -> (i32, i32) {
    %c0_i32 = arith.constant 0 : i32
    %c0_i32_0 = arith.constant 0 : i32
    %c0_i32_1 = arith.constant 0 : i32
    return %c0_i32, %c0_i32_0 : i32, i32
  }
  func.func @transform_2(%arg0: i32) -> (i32, i32) {
    %c0_i32 = arith.constant 0 : i32
    %c0_i32_0 = arith.constant 0 : i32
    %c0_i32_1 = arith.constant 0 : i32
    return %c0_i32, %c0_i32_0 : i32, i32
  }
  func.func @transform_3(%arg0: i32) -> (i32, i32) {
    %c0_i32 = arith.constant 0 : i32
    %c0_i32_0 = arith.constant 0 : i32
    return %arg0, %c0_i32 : i32, i32
  }
}

module attributes {stable_mosaic.version = 11 : i64} {
  func.func @_conv_relu_pool_kernel(%arg0: i32, %arg1: memref<4x32x256xf32, #tpu.memory_space<vmem>>, %arg2: memref<256x128xf32, #tpu.memory_space<vmem>>, %arg3: memref<1x128xf32, #tpu.memory_space<vmem>>, %arg4: memref<32x128xf32, #tpu.memory_space<vmem>>) attributes {dimension_semantics = [#tpu.dimension_semantics<parallel>], iteration_bounds = array<i64: 1>, scalar_prefetch = 0 : i64, scratch_operands = 0 : i64, tpu.core_type = #tpu.core_type<tc>, window_params = [{transform_indices = @transform_0, window_bounds = array<i64: 4, 32, 256>}, {pipeline_mode = #tpu.pipeline_mode<synchronous>, transform_indices = @transform_1, window_bounds = array<i64: 256, 128>}, {pipeline_mode = #tpu.pipeline_mode<synchronous>, transform_indices = @transform_2, window_bounds = array<i64: 1, 128>}, {transform_indices = @transform_3, window_bounds = array<i64: 32, 128>}]} {
    %c0 = arith.constant 0 : index
    %c0_0 = arith.constant 0 : index
    %c0_1 = arith.constant 0 : index
    %0 = vector.load %arg1[%c0, %c0_0, %c0_1] : memref<4x32x256xf32, #tpu.memory_space<vmem>>, vector<4x32x256xf32>
    %1 = vector.shape_cast %0 : vector<4x32x256xf32> to vector<128x256xf32>
    %c0_2 = arith.constant 0 : index
    %c0_3 = arith.constant 0 : index
    %2 = vector.load %arg2[%c0_2, %c0_3] : memref<256x128xf32, #tpu.memory_space<vmem>>, vector<256x128xf32>
    %cst = arith.constant dense<0.000000e+00> : vector<128x128xf32>
    %3 = tpu.matmul %1, %2, %cst {dimension_numbers = #tpu.dot_dimension_numbers<[1], [0], [0], [1], [0, 0, 1, 1], [], []>} : vector<128x256xf32>, vector<256x128xf32>, vector<128x128xf32> -> vector<128x128xf32>
    %4 = vector.extract_strided_slice %3 {offsets = [0, 0], sizes = [32, 128], strides = [1, 1]} : vector<128x128xf32> to vector<32x128xf32>
    %5 = vector.extract_strided_slice %3 {offsets = [32, 0], sizes = [32, 128], strides = [1, 1]} : vector<128x128xf32> to vector<32x128xf32>
    %6 = arith.maximumf %4, %5 : vector<32x128xf32>
    %7 = vector.extract_strided_slice %3 {offsets = [64, 0], sizes = [32, 128], strides = [1, 1]} : vector<128x128xf32> to vector<32x128xf32>
    %8 = vector.extract_strided_slice %3 {offsets = [96, 0], sizes = [32, 128], strides = [1, 1]} : vector<128x128xf32> to vector<32x128xf32>
    %9 = arith.maximumf %7, %8 : vector<32x128xf32>
    %10 = arith.maximumf %6, %9 : vector<32x128xf32>
    %c0_4 = arith.constant 0 : index
    %c0_5 = arith.constant 0 : index
    %11 = vector.load %arg3[%c0_4, %c0_5] : memref<1x128xf32, #tpu.memory_space<vmem>>, vector<1x128xf32>
    %12 = vector.broadcast %11 : vector<1x128xf32> to vector<32x128xf32>
    %13 = arith.addf %10, %12 : vector<32x128xf32>
    %cst_6 = arith.constant 0.000000e+00 : f32
    %14 = vector.broadcast %cst_6 : f32 to vector<32x128xf32>
    %15 = arith.maximumf %13, %14 : vector<32x128xf32>
    %c0_7 = arith.constant 0 : index
    %c0_8 = arith.constant 0 : index
    %16 = vector.load %arg4[%c0_7, %c0_8] : memref<32x128xf32, #tpu.memory_space<vmem>>, vector<32x128xf32>
    tpu.vector_store %arg4[%c0_7, %c0_8], %15 {strides = array<i32>} : memref<32x128xf32, #tpu.memory_space<vmem>>, vector<32x128xf32>,
    return
  }
  func.func @transform_0(%arg0: i32) -> (i32, i32, i32) {
    %c0_i32 = arith.constant 0 : i32
    %c0_i32_0 = arith.constant 0 : i32
    %c0_i32_1 = arith.constant 0 : i32
    return %c0_i32, %arg0, %c0_i32_0 : i32, i32, i32
  }
  func.func @transform_1(%arg0: i32) -> (i32, i32) {
    %c0_i32 = arith.constant 0 : i32
    %c0_i32_0 = arith.constant 0 : i32
    %c0_i32_1 = arith.constant 0 : i32
    return %c0_i32, %c0_i32_0 : i32, i32
  }
  func.func @transform_2(%arg0: i32) -> (i32, i32) {
    %c0_i32 = arith.constant 0 : i32
    %c0_i32_0 = arith.constant 0 : i32
    %c0_i32_1 = arith.constant 0 : i32
    return %c0_i32, %c0_i32_0 : i32, i32
  }
  func.func @transform_3(%arg0: i32) -> (i32, i32) {
    %c0_i32 = arith.constant 0 : i32
    %c0_i32_0 = arith.constant 0 : i32
    return %arg0, %c0_i32 : i32, i32
  }
}

module attributes {stable_mosaic.version = 11 : i64} {
  func.func @_fc_kernel(%arg0: i32, %arg1: memref<8x320xf32, #tpu.memory_space<vmem>>, %arg2: memref<320x128xf32, #tpu.memory_space<vmem>>, %arg3: memref<1x128xf32, #tpu.memory_space<vmem>>, %arg4: memref<8x128xf32, #tpu.memory_space<vmem>>) attributes {dimension_semantics = [#tpu.dimension_semantics<parallel>], iteration_bounds = array<i64: 1>, scalar_prefetch = 0 : i64, scratch_operands = 0 : i64, tpu.core_type = #tpu.core_type<tc>, window_params = [{transform_indices = @transform_0, window_bounds = array<i64: 8, 320>}, {pipeline_mode = #tpu.pipeline_mode<synchronous>, transform_indices = @transform_1, window_bounds = array<i64: 320, 128>}, {pipeline_mode = #tpu.pipeline_mode<synchronous>, transform_indices = @transform_2, window_bounds = array<i64: 1, 128>}, {transform_indices = @transform_3, window_bounds = array<i64: 8, 128>}]} {
    %c0 = arith.constant 0 : index
    %c0_0 = arith.constant 0 : index
    %0 = vector.load %arg1[%c0, %c0_0] : memref<8x320xf32, #tpu.memory_space<vmem>>, vector<8x320xf32>
    %c0_1 = arith.constant 0 : index
    %c0_2 = arith.constant 0 : index
    %1 = vector.load %arg2[%c0_1, %c0_2] : memref<320x128xf32, #tpu.memory_space<vmem>>, vector<320x128xf32>
    %cst = arith.constant dense<0.000000e+00> : vector<8x128xf32>
    %2 = tpu.matmul %0, %1, %cst {dimension_numbers = #tpu.dot_dimension_numbers<[1], [0], [0], [1], [0, 0, 1, 1], [], []>} : vector<8x320xf32>, vector<320x128xf32>, vector<8x128xf32> -> vector<8x128xf32>
    %c0_3 = arith.constant 0 : index
    %c0_4 = arith.constant 0 : index
    %3 = vector.load %arg3[%c0_3, %c0_4] : memref<1x128xf32, #tpu.memory_space<vmem>>, vector<1x128xf32>
    %4 = vector.broadcast %3 : vector<1x128xf32> to vector<8x128xf32>
    %5 = arith.addf %2, %4 : vector<8x128xf32>
    %c0_5 = arith.constant 0 : index
    %c0_6 = arith.constant 0 : index
    %6 = vector.load %arg4[%c0_5, %c0_6] : memref<8x128xf32, #tpu.memory_space<vmem>>, vector<8x128xf32>
    tpu.vector_store %arg4[%c0_5, %c0_6], %5 {strides = array<i32>} : memref<8x128xf32, #tpu.memory_space<vmem>>, vector<8x128xf32>,
    return
  }
  func.func @transform_0(%arg0: i32) -> (i32, i32) {
    %c0_i32 = arith.constant 0 : i32
    %c0_i32_0 = arith.constant 0 : i32
    return %arg0, %c0_i32 : i32, i32
  }
  func.func @transform_1(%arg0: i32) -> (i32, i32) {
    %c0_i32 = arith.constant 0 : i32
    %c0_i32_0 = arith.constant 0 : i32
    %c0_i32_1 = arith.constant 0 : i32
    return %c0_i32, %c0_i32_0 : i32, i32
  }
  func.func @transform_2(%arg0: i32) -> (i32, i32) {
    %c0_i32 = arith.constant 0 : i32
    %c0_i32_0 = arith.constant 0 : i32
    %c0_i32_1 = arith.constant 0 : i32
    return %c0_i32, %c0_i32_0 : i32, i32
  }
  func.func @transform_3(%arg0: i32) -> (i32, i32) {
    %c0_i32 = arith.constant 0 : i32
    %c0_i32_0 = arith.constant 0 : i32
    return %arg0, %c0_i32 : i32, i32
  }
}

</mosaic_0001>

<bundles_post_ra>
// kernel: net_forward.3
= control target key start
LH: loop header
LB: loop body
LE: loop exit
PB: predicated region body
PF: predicated region fallthrough
CT: control target
= control target key end

     0   :  { %vm162_vm0 = vcmask 261120   ;;  %s3109_s1 = inlined_call_operand.vmem [shape: f32[32,128], index: 1, kind: input, shape index: {}]   ;;  %s3110_s0 = inlined_call_operand.vmem [shape: f32[4,288,32], index: 0, kind: input, shape index: {}]   ;;  %s3111_s2 = inlined_call_operand.vmem [shape: f32[1,128], index: 2, kind: input, shape index: {}]   ;;  %s3112_s3 = inlined_call_operand.vmem [shape: f32[288,128], index: 3, kind: output, shape index: {}]  }
   0x1   :  { %v158_v0 = vld [vmem:[%s3109_s1] sm:$0xff]  ;;  %v159_v1 = vld [vmem:[%s3109_s1 + $0x8] sm:$0xff]  ;;  %v160_v2 = vld [vmem:[%s3109_s1 + $0x10] sm:$0xff] }
   0x2   :  { %v2124_v3 = vpack.c.bf16 %v159_v1, %v158_v0  ;;  %v161_v4 = vld [vmem:[%s3109_s1 + $0x18] sm:$0xff]  ;;  %v14_v5 = vld [vmem:[%s3110_s0] sm:$0xff]  ;;  %v15_v8 = vld [vmem:[%s3110_s0 + $0x8] sm:$0xff] }
   0x3   :  { %v86_v6 = vld [vmem:[%s3110_s0 + $0x240] sm:$0xff]  ;;  %v2128_v7 = vpack.c.bf16 %v161_v4, %v160_v2  ;;  %1908 = vmatprep.mubr.msk.f32.mxu0 %vm162_vm0, %v14_v5  ;;  %v87_v9 = vld [vmem:[%s3110_s0 + $0x248] sm:$0xff]  ;;  %v16_v10 = vld [vmem:[%s3110_s0 + $0x10] sm:$0xff] }
   0x4   :  { %2016 = vmatprep.mubr.msk.f32.mxu1 %vm162_vm0, %v86_v6  ;;  %2125 = vmatprep.subr.bf16.mxu0 %v2124_v3  ;;  %v88_v11 = vld [vmem:[%s3110_s0 + $0x250] sm:$0xff]  ;;  %v17_v12 = vld [vmem:[%s3110_s0 + $0x18] sm:$0xff]  ;;  %v18_v14 = vld [vmem:[%s3110_s0 + $0x20] sm:$0xff] }
   0x5   :  { %2132 = vmatprep.subr.bf16.mxu1 %v2124_v3  ;;  %2127 = vmatpush3.bf16.msra.mxu0 %v2124_v3  ;;  %v89_v13 = vld [vmem:[%s3110_s0 + $0x258] sm:$0xff]  ;;  %v90_v15 = vld [vmem:[%s3110_s0 + $0x260] sm:$0xff]  ;;  %v19_v16 = vld [vmem:[%s3110_s0 + $0x28] sm:$0xff] }
   0x6   :  { %2134 = vmatpush3.bf16.msra.mxu1 %v2124_v3  ;;  %2129 = vmatprep.subr.bf16.mxu0 %v2128_v7  ;;  %v91_v17 = vld [vmem:[%s3110_s0 + $0x268] sm:$0xff]  ;;  %v20_v18 = vld [vmem:[%s3110_s0 + $0x30] sm:$0xff]  ;;  %v21_v20 = vld [vmem:[%s3110_s0 + $0x38] sm:$0xff] }
   0x7   :  { %2133 = vmatprep.subr.bf16.mxu1 %v2128_v7  ;;  %v92_v19 = vld [vmem:[%s3110_s0 + $0x270] sm:$0xff]  ;;  %v93_v21 = vld [vmem:[%s3110_s0 + $0x278] sm:$0xff]  ;;  %v22_v22 = vld [vmem:[%s3110_s0 + $0x40] sm:$0xff] }
   0x8   :  { %v94_v23 = vld [vmem:[%s3110_s0 + $0x280] sm:$0xff]  ;;  %v23_v24 = vld [vmem:[%s3110_s0 + $0x48] sm:$0xff]  ;;  %v24_v26 = vld [vmem:[%s3110_s0 + $0x50] sm:$0xff] }
   0x9   :  { %2131 = vmatpush3.bf16.msra.mxu0 %v2128_v7  ;;  %v95_v25 = vld [vmem:[%s3110_s0 + $0x288] sm:$0xff]  ;;  %v96_v27 = vld [vmem:[%s3110_s0 + $0x290] sm:$0xff]  ;;  %v25_v28 = vld [vmem:[%s3110_s0 + $0x58] sm:$0xff] }
   0xa   :  { %2135 = vmatpush3.bf16.msra.mxu1 %v2128_v7  ;;  %v97_v29 = vld [vmem:[%s3110_s0 + $0x298] sm:$0xff]  ;;  %v26_v30 = vld [vmem:[%s3110_s0 + $0x60] sm:$0xff]  ;;  %v27_v32 = vld [vmem:[%s3110_s0 + $0x68] sm:$0xff] }
   0xb   :  { %v98_v31 = vld [vmem:[%s3110_s0 + $0x2a0] sm:$0xff]  ;;  %v99_v33 = vld [vmem:[%s3110_s0 + $0x2a8] sm:$0xff]  ;;  %v28_v34 = vld [vmem:[%s3110_s0 + $0x70] sm:$0xff] }
   0xc   :  { %1909 = vmatmul.mubr.msk.f32.vlgmr.msra.gmra.mrb[0].mxu0 %vm162_vm0, %v15_v8  ;;  %v100_v35 = vld [vmem:[%s3110_s0 + $0x2b0] sm:$0xff]  ;;  %v29_v36 = vld [vmem:[%s3110_s0 + $0x78] sm:$0xff]  ;;  %v30_v38 = vld [vmem:[%s3110_s0 + $0x80] sm:$0xff] }
   0xd   :  { %2017 = vmatmul.mubr.msk.f32.vlgmr.msra.gmra.mrb[0].mxu1 %vm162_vm0, %v87_v9  ;;  %1911 = vmatprep.mubr.msk.f32.mxu0 %vm162_vm0, %v16_v10  ;;  %v101_v37 = vld [vmem:[%s3110_s0 + $0x2b8] sm:$0xff]  ;;  %v102_v39 = vld [vmem:[%s3110_s0 + $0x2c0] sm:$0xff]  ;;  %v31_v40 = vld [vmem:[%s3110_s0 + $0x88] sm:$0xff] }
   0xe   :  { %2019 = vmatprep.mubr.msk.f32.mxu1 %vm162_vm0, %v88_v11  ;;  %v103_v41 = vld [vmem:[%s3110_s0 + $0x2c8] sm:$0xff]  ;;  %v32_v42 = vld [vmem:[%s3110_s0 + $0x90] sm:$0xff]  ;;  %v33_v44 = vld [vmem:[%s3110_s0 + $0x98] sm:$0xff] }
   0xf   :  { %v104_v43 = vld [vmem:[%s3110_s0 + $0x2d0] sm:$0xff]  ;;  %v105_v45 = vld [vmem:[%s3110_s0 + $0x2d8] sm:$0xff]  ;;  %v34_v46 = vld [vmem:[%s3110_s0 + $0xa0] sm:$0xff] }
  0x10   :  { %1912 = vmatmul.mubr.msk.f32.gmra.mrb[2].mxu0 %vm162_vm0, %v17_v12  ;;  %v106_v47 = vld [vmem:[%s3110_s0 + $0x2e0] sm:$0xff]  ;;  %v35_v48 = vld [vmem:[%s3110_s0 + $0xa8] sm:$0xff]  ;;  %v36_v50 = vld [vmem:[%s3110_s0 + $0xb0] sm:$0xff] }
  0x11   :  { %2020 = vmatmul.mubr.msk.f32.gmra.mrb[2].mxu1 %vm162_vm0, %v89_v13  ;;  %1914 = vmatprep.mubr.msk.f32.mxu0 %vm162_vm0, %v18_v14  ;;  %v107_v49 = vld [vmem:[%s3110_s0 + $0x2e8] sm:$0xff]  ;;  %v108_v51 = vld [vmem:[%s3110_s0 + $0x2f0] sm:$0xff]  ;;  %v37_v52 = vld [vmem:[%s3110_s0 + $0xb8] sm:$0xff] }
  0x12   :  { %2022 = vmatprep.mubr.msk.f32.mxu1 %vm162_vm0, %v90_v15  ;;  %v109_v53 = vld [vmem:[%s3110_s0 + $0x2f8] sm:$0xff]  ;;  %v38_v54 = vld [vmem:[%s3110_s0 + $0xc0] sm:$0xff]  ;;  %v39_v56 = vld [vmem:[%s3110_s0 + $0xc8] sm:$0xff] }
  0x13   :  { %v110_v55 = vld [vmem:[%s3110_s0 + $0x300] sm:$0xff]  ;;  %v111_v57 = vld [vmem:[%s3110_s0 + $0x308] sm:$0xff]  ;;  %v40_v58 = vld [vmem:[%s3110_s0 + $0xd0] sm:$0xff] }
  0x14   :  { %1915 = vmatmul.mubr.msk.f32.gmra.mrb[4].mxu0 %vm162_vm0, %v19_v16  ;;  %v112_v59 = vld [vmem:[%s3110_s0 + $0x310] sm:$0xff]  ;;  %v41_v60 = vld [vmem:[%s3110_s0 + $0xd8] sm:$0xff]  ;;  %v42_v62 = vld [vmem:[%s3110_s0 + $0xe0] sm:$0xff] }
  0x15   :  { %2023 = vmatmul.mubr.msk.f32.gmra.mrb[4].mxu1 %vm162_vm0, %v91_v17  ;;  %1917 = vmatprep.mubr.msk.f32.mxu0 %vm162_vm0, %v20_v18  ;;  %v113_v61 = vld [vmem:[%s3110_s0 + $0x318] sm:$0xff]  ;;  %v114_v63 = vld [vmem:[%s3110_s0 + $0x320] sm:$0xff]  ;;  %v43_v0 = vld [vmem:[%s3110_s0 + $0xe8] sm:$0xff] }
  0x16   :  { %2025 = vmatprep.mubr.msk.f32.mxu1 %vm162_vm0, %v92_v19  ;;  %v115_v1 = vld [vmem:[%s3110_s0 + $0x328] sm:$0xff]  ;;  %v44_v2 = vld [vmem:[%s3110_s0 + $0xf0] sm:$0xff]  ;;  %v45_v4 = vld [vmem:[%s3110_s0 + $0xf8] sm:$0xff] }
  0x17   :  { %v116_v3 = vld [vmem:[%s3110_s0 + $0x330] sm:$0xff]  ;;  %v117_v5 = vld [vmem:[%s3110_s0 + $0x338] sm:$0xff]  ;;  %v46_v6 = vld [vmem:[%s3110_s0 + $0x100] sm:$0xff] }
  0x18   :  { %1918 = vmatmul.mubr.msk.f32.gmra.mrb[6].mxu0 %vm162_vm0, %v21_v20  ;;  %v118_v7 = vld [vmem:[%s3110_s0 + $0x340] sm:$0xff]  ;;  %v47_v8 = vld [vmem:[%s3110_s0 + $0x108] sm:$0xff]  ;;  %v48_v10 = vld [vmem:[%s3110_s0 + $0x110] sm:$0xff] }
  0x19   :  { %2026 = vmatmul.mubr.msk.f32.gmra.mrb[6].mxu1 %vm162_vm0, %v93_v21  ;;  %1920 = vmatprep.mubr.msk.f32.mxu0 %vm162_vm0, %v22_v22  ;;  %v119_v9 = vld [vmem:[%s3110_s0 + $0x348] sm:$0xff]  ;;  %v120_v11 = vld [vmem:[%s3110_s0 + $0x350] sm:$0xff]  ;;  %v49_v12 = vld [vmem:[%s3110_s0 + $0x118] sm:$0xff] }
  0x1a   :  { %2028 = vmatprep.mubr.msk.f32.mxu1 %vm162_vm0, %v94_v23  ;;  %v121_v13 = vld [vmem:[%s3110_s0 + $0x358] sm:$0xff]  ;;  %v50_v14 = vld [vmem:[%s3110_s0 + $0x120] sm:$0xff]  ;;  %v51_v16 = vld [vmem:[%s3110_s0 + $0x128] sm:$0xff] }
  0x1b   :  { %v122_v15 = vld [vmem:[%s3110_s0 + $0x360] sm:$0xff]  ;;  %v123_v17 = vld [vmem:[%s3110_s0 + $0x368] sm:$0xff]  ;;  %v52_v18 = vld [vmem:[%s3110_s0 + $0x130] sm:$0xff] }
  0x1c   :  { %1921 = vmatmul.mubr.msk.f32.gmra.mrb[8].mxu0 %vm162_vm0, %v23_v24  ;;  %v124_v19 = vld [vmem:[%s3110_s0 + $0x370] sm:$0xff]  ;;  %v53_v20 = vld [vmem:[%s3110_s0 + $0x138] sm:$0xff]  ;;  %v54_v22 = vld [vmem:[%s3110_s0 + $0x140] sm:$0xff] }
  0x1d   :  { %2029 = vmatmul.mubr.msk.f32.gmra.mrb[8].mxu1 %vm162_vm0, %v95_v25  ;;  %1923 = vmatprep.mubr.msk.f32.mxu0 %vm162_vm0, %v24_v26  ;;  %v125_v21 = vld [vmem:[%s3110_s0 + $0x378] sm:$0xff]  ;;  %v126_v23 = vld [vmem:[%s3110_s0 + $0x380] sm:$0xff]  ;;  %v55_v24 = vld [vmem:[%s3110_s0 + $0x148] sm:$0xff] }
  0x1e   :  { %2031 = vmatprep.mubr.msk.f32.mxu1 %vm162_vm0, %v96_v27  ;;  %v127_v25 = vld [vmem:[%s3110_s0 + $0x388] sm:$0xff]  ;;  %v56_v26 = vld [vmem:[%s3110_s0 + $0x150] sm:$0xff] }
  0x1f   :  { %v128_v27 = vld [vmem:[%s3110_s0 + $0x390] sm:$0xff] }
  0x20   :  { %1924 = vmatmul.mubr.msk.f32.gmra.mrb[10].mxu0 %vm162_vm0, %v25_v28  ;;  %v57_v28 = vld [vmem:[%s3110_s0 + $0x158] sm:$0xff] }
  0x21   :  { %2032 = vmatmul.mubr.msk.f32.gmra.mrb[10].mxu1 %vm162_vm0, %v97_v29  ;;  %1926 = vmatprep.mubr.msk.f32.mxu0 %vm162_vm0, %v26_v30  ;;  %v129_v29 = vld [vmem:[%s3110_s0 + $0x398] sm:$0xff]  ;;  %v58_v30 = vld [vmem:[%s3110_s0 + $0x160] sm:$0xff] }
  0x22   :  { %2034 = vmatprep.mubr.msk.f32.mxu1 %vm162_vm0, %v98_v31  ;;  %v130_v31 = vld [vmem:[%s3110_s0 + $0x3a0] sm:$0xff] }
  0x24   :  { %1927 = vmatmul.mubr.msk.f32.gmra.mrb[12].mxu0 %vm162_vm0, %v27_v32  ;;  %v59_v32 = vld [vmem:[%s3110_s0 + $0x168] sm:$0xff] }
  0x25   :  { %2035 = vmatmul.mubr.msk.f32.gmra.mrb[12].mxu1 %vm162_vm0, %v99_v33  ;;  %1929 = vmatprep.mubr.msk.f32.mxu0 %vm162_vm0, %v28_v34  ;;  %v131_v33 = vld [vmem:[%s3110_s0 + $0x3a8] sm:$0xff]  ;;  %v60_v34 = vld [vmem:[%s3110_s0 + $0x170] sm:$0xff] }
  0x26   :  { %2037 = vmatprep.mubr.msk.f32.mxu1 %vm162_vm0, %v100_v35  ;;  %v132_v35 = vld [vmem:[%s3110_s0 + $0x3b0] sm:$0xff] }
  0x28   :  { %1930 = vmatmul.mubr.msk.f32.gmra.mrb[14].mxu0 %vm162_vm0, %v29_v36  ;;  %v61_v36 = vld [vmem:[%s3110_s0 + $0x178] sm:$0xff] }
  0x29   :  { %2038 = vmatmul.mubr.msk.f32.gmra.mrb[14].mxu1 %vm162_vm0, %v101_v37  ;;  %1932 = vmatprep.mubr.msk.f32.mxu0 %vm162_vm0, %v30_v38  ;;  %v133_v37 = vld [vmem:[%s3110_s0 + $0x3b8] sm:$0xff]  ;;  %v62_v38 = vld [vmem:[%s3110_s0 + $0x180] sm:$0xff] }
  0x2a   :  { %2040 = vmatprep.mubr.msk.f32.mxu1 %vm162_vm0, %v102_v39  ;;  %v134_v39 = vld [vmem:[%s3110_s0 + $0x3c0] sm:$0xff] }
  0x2c   :  { %1933 = vmatmul.mubr.msk.f32.gmra.mrb[16].mxu0 %vm162_vm0, %v31_v40  ;;  %v63_v40 = vld [vmem:[%s3110_s0 + $0x188] sm:$0xff] }
  0x2d   :  { %2041 = vmatmul.mubr.msk.f32.gmra.mrb[16].mxu1 %vm162_vm0, %v103_v41  ;;  %1935 = vmatprep.mubr.msk.f32.mxu0 %vm162_vm0, %v32_v42  ;;  %v135_v41 = vld [vmem:[%s3110_s0 + $0x3c8] sm:$0xff]  ;;  %v64_v42 = vld [vmem:[%s3110_s0 + $0x190] sm:$0xff] }
  0x2e   :  { %2043 = vmatprep.mubr.msk.f32.mxu1 %vm162_vm0, %v104_v43  ;;  %v136_v43 = vld [vmem:[%s3110_s0 + $0x3d0] sm:$0xff] }
  0x30   :  { %1936 = vmatmul.mubr.msk.f32.gmra.mrb[18].mxu0 %vm162_vm0, %v33_v44  ;;  %v65_v44 = vld [vmem:[%s3110_s0 + $0x198] sm:$0xff] }
  0x31   :  { %2044 = vmatmul.mubr.msk.f32.gmra.mrb[18].mxu1 %vm162_vm0, %v105_v45  ;;  %1938 = vmatprep.mubr.msk.f32.mxu0 %vm162_vm0, %v34_v46  ;;  %v137_v45 = vld [vmem:[%s3110_s0 + $0x3d8] sm:$0xff]  ;;  %v66_v46 = vld [vmem:[%s3110_s0 + $0x1a0] sm:$0xff] }
  0x32   :  { %2046 = vmatprep.mubr.msk.f32.mxu1 %vm162_vm0, %v106_v47  ;;  %v138_v47 = vld [vmem:[%s3110_s0 + $0x3e0] sm:$0xff] }
  0x34   :  { %1939 = vmatmul.mubr.msk.f32.gmra.mrb[20].mxu0 %vm162_vm0, %v35_v48  ;;  %v67_v48 = vld [vmem:[%s3110_s0 + $0x1a8] sm:$0xff] }
  0x35   :  { %2047 = vmatmul.mubr.msk.f32.gmra.mrb[20].mxu1 %vm162_vm0, %v107_v49  ;;  %1941 = vmatprep.mubr.msk.f32.mxu0 %vm162_vm0, %v36_v50  ;;  %v139_v49 = vld [vmem:[%s3110_s0 + $0x3e8] sm:$0xff]  ;;  %v68_v50 = vld [vmem:[%s3110_s0 + $0x1b0] sm:$0xff] }
  0x36   :  { %2049 = vmatprep.mubr.msk.f32.mxu1 %vm162_vm0, %v108_v51  ;;  %v140_v51 = vld [vmem:[%s3110_s0 + $0x3f0] sm:$0xff] }
  0x38   :  { %1942 = vmatmul.mubr.msk.f32.gmra.mrb[22].mxu0 %vm162_vm0, %v37_v52  ;;  %v69_v52 = vld [vmem:[%s3110_s0 + $0x1b8] sm:$0xff] }
  0x39   :  { %2050 = vmatmul.mubr.msk.f32.gmra.mrb[22].mxu1 %vm162_vm0, %v109_v53  ;;  %1944 = vmatprep.mubr.msk.f32.mxu0 %vm162_vm0, %v38_v54  ;;  %v141_v53 = vld [vmem:[%s3110_s0 + $0x3f8] sm:$0xff]  ;;  %v70_v54 = vld [vmem:[%s3110_s0 + $0x1c0] sm:$0xff] }
  0x3a   :  { %2052 = vmatprep.mubr.msk.f32.mxu1 %vm162_vm0, %v110_v55  ;;  %v142_v55 = vld [vmem:[%s3110_s0 + $0x400] sm:$0xff] }
  0x3c   :  { %1945 = vmatmul.mubr.msk.f32.gmra.mrb[24].mxu0 %vm162_vm0, %v39_v56  ;;  %v71_v56 = vld [vmem:[%s3110_s0 + $0x1c8] sm:$0xff] }
  0x3d   :  { %2053 = vmatmul.mubr.msk.f32.gmra.mrb[24].mxu1 %vm162_vm0, %v111_v57  ;;  %1947 = vmatprep.mubr.msk.f32.mxu0 %vm162_vm0, %v40_v58  ;;  %v143_v57 = vld [vmem:[%s3110_s0 + $0x408] sm:$0xff]  ;;  %v72_v58 = vld [vmem:[%s3110_s0 + $0x1d0] sm:$0xff] }
  0x3e   :  { %2055 = vmatprep.mubr.msk.f32.mxu1 %vm162_vm0, %v112_v59  ;;  %v144_v59 = vld [vmem:[%s3110_s0 + $0x410] sm:$0xff] }
  0x40   :  { %1948 = vmatmul.mubr.msk.f32.gmra.mrb[26].mxu0 %vm162_vm0, %v41_v60  ;;  %v73_v60 = vld [vmem:[%s3110_s0 + $0x1d8] sm:$0xff] }
  0x41   :  { %2056 = vmatmul.mubr.msk.f32.gmra.mrb[26].mxu1 %vm162_vm0, %v113_v61  ;;  %1950 = vmatprep.mubr.msk.f32.mxu0 %vm162_vm0, %v42_v62  ;;  %v145_v61 = vld [vmem:[%s3110_s0 + $0x418] sm:$0xff]  ;;  %v74_v62 = vld [vmem:[%s3110_s0 + $0x1e0] sm:$0xff] }
  0x42   :  { %2058 = vmatprep.mubr.msk.f32.mxu1 %vm162_vm0, %v114_v63  ;;  %v146_v63 = vld [vmem:[%s3110_s0 + $0x420] sm:$0xff] }
  0x44   :  { %1951 = vmatmul.mubr.msk.f32.gmra.mrb[28].mxu0 %vm162_vm0, %v43_v0  ;;  %v75_v0 = vld [vmem:[%s3110_s0 + $0x1e8] sm:$0xff] }
  0x45   :  { %2059 = vmatmul.mubr.msk.f32.gmra.mrb[28].mxu1 %vm162_vm0, %v115_v1  ;;  %1953 = vmatprep.mubr.msk.f32.mxu0 %vm162_vm0, %v44_v2  ;;  %v147_v1 = vld [vmem:[%s3110_s0 + $0x428] sm:$0xff]  ;;  %v76_v2 = vld [vmem:[%s3110_s0 + $0x1f0] sm:$0xff] }
  0x46   :  { %2061 = vmatprep.mubr.msk.f32.mxu1 %vm162_vm0, %v116_v3  ;;  %v148_v3 = vld [vmem:[%s3110_s0 + $0x430] sm:$0xff] }
  0x48   :  { %1954 = vmatmul.mubr.msk.f32.gmra.mrb[30].mxu0 %vm162_vm0, %v45_v4  ;;  %v77_v4 = vld [vmem:[%s3110_s0 + $0x1f8] sm:$0xff] }
  0x49   :  { %2062 = vmatmul.mubr.msk.f32.gmra.mrb[30].mxu1 %vm162_vm0, %v117_v5  ;;  %1956 = vmatprep.mubr.msk.f32.mxu0 %vm162_vm0, %v46_v6  ;;  %v149_v5 = vld [vmem:[%s3110_s0 + $0x438] sm:$0xff]  ;;  %v78_v6 = vld [vmem:[%s3110_s0 + $0x200] sm:$0xff] }
  0x4a   :  { %2064 = vmatprep.mubr.msk.f32.mxu1 %vm162_vm0, %v118_v7  ;;  %v150_v7 = vld [vmem:[%s3110_s0 + $0x440] sm:$0xff] }
  0x4c   :  { %1957 = vmatmul.mubr.msk.f32.gmra.mrb[32].mxu0 %vm162_vm0, %v47_v8  ;;  %v79_v8 = vld [vmem:[%s3110_s0 + $0x208] sm:$0xff] }
  0x4d   :  { %2065 = vmatmul.mubr.msk.f32.gmra.mrb[32].mxu1 %vm162_vm0, %v119_v9  ;;  %1959 = vmatprep.mubr.msk.f32.mxu0 %vm162_vm0, %v48_v10  ;;  %v151_v9 = vld [vmem:[%s3110_s0 + $0x448] sm:$0xff]  ;;  %v80_v10 = vld [vmem:[%s3110_s0 + $0x210] sm:$0xff] }
  0x4e   :  { %2067 = vmatprep.mubr.msk.f32.mxu1 %vm162_vm0, %v120_v11  ;;  %v152_v11 = vld [vmem:[%s3110_s0 + $0x450] sm:$0xff] }
  0x50   :  { %1960 = vmatmul.mubr.msk.f32.gmra.mrb[34].mxu0 %vm162_vm0, %v49_v12  ;;  %v81_v12 = vld [vmem:[%s3110_s0 + $0x218] sm:$0xff] }
  0x51   :  { %2068 = vmatmul.mubr.msk.f32.gmra.mrb[34].mxu1 %vm162_vm0, %v121_v13  ;;  %1962 = vmatprep.mubr.msk.f32.mxu0 %vm162_vm0, %v50_v14  ;;  %v153_v13 = vld [vmem:[%s3110_s0 + $0x458] sm:$0xff]  ;;  %v82_v14 = vld [vmem:[%s3110_s0 + $0x220] sm:$0xff] }
  0x52   :  { %2070 = vmatprep.mubr.msk.f32.mxu1 %vm162_vm0, %v122_v15  ;;  %v154_v15 = vld [vmem:[%s3110_s0 + $0x460] sm:$0xff] }
  0x54   :  { %1963 = vmatmul.mubr.msk.f32.gmra.mrb[36].mxu0 %vm162_vm0, %v51_v16  ;;  %v83_v16 = vld [vmem:[%s3110_s0 + $0x228] sm:$0xff] }
  0x55   :  { %2071 = vmatmul.mubr.msk.f32.gmra.mrb[36].mxu1 %vm162_vm0, %v123_v17  ;;  %1965 = vmatprep.mubr.msk.f32.mxu0 %vm162_vm0, %v52_v18  ;;  %v155_v17 = vld [vmem:[%s3110_s0 + $0x468] sm:$0xff]  ;;  %v84_v18 = vld [vmem:[%s3110_s0 + $0x230] sm:$0xff] }
  0x56   :  { %2073 = vmatprep.mubr.msk.f32.mxu1 %vm162_vm0, %v124_v19  ;;  %v156_v19 = vld [vmem:[%s3110_s0 + $0x470] sm:$0xff] }
  0x58   :  { %1966 = vmatmul.mubr.msk.f32.gmra.mrb[38].mxu0 %vm162_vm0, %v53_v20  ;;  %v85_v20 = vld [vmem:[%s3110_s0 + $0x238] sm:$0xff] }
  0x59   :  { %2074 = vmatmul.mubr.msk.f32.gmra.mrb[38].mxu1 %vm162_vm0, %v125_v21  ;;  %1968 = vmatprep.mubr.msk.f32.mxu0 %vm162_vm0, %v54_v22  ;;  %v157_v21 = vld [vmem:[%s3110_s0 + $0x478] sm:$0xff] }
  0x5a   :  { %2076 = vmatprep.mubr.msk.f32.mxu1 %vm162_vm0, %v126_v23 }
  0x5c   :  { %1969 = vmatmul.mubr.msk.f32.gmra.mrb[40].mxu0 %vm162_vm0, %v55_v24 }
  0x5d   :  { %2077 = vmatmul.mubr.msk.f32.gmra.mrb[40].mxu1 %vm162_vm0, %v127_v25  ;;  %1971 = vmatprep.mubr.msk.f32.mxu0 %vm162_vm0, %v56_v26 }
  0x5e   :  { %2079 = vmatprep.mubr.msk.f32.mxu1 %vm162_vm0, %v128_v27 }
  0x60   :  { %1972 = vmatmul.mubr.msk.f32.gmra.mrb[42].mxu0 %vm162_vm0, %v57_v28 }
  0x61   :  { %2080 = vmatmul.mubr.msk.f32.gmra.mrb[42].mxu1 %vm162_vm0, %v129_v29  ;;  %1974 = vmatprep.mubr.msk.f32.mxu0 %vm162_vm0, %v58_v30 }
  0x62   :  { %2082 = vmatprep.mubr.msk.f32.mxu1 %vm162_vm0, %v130_v31 }
  0x64   :  { %1975 = vmatmul.mubr.msk.f32.gmra.mrb[44].mxu0 %vm162_vm0, %v59_v32 }
  0x65   :  { %2083 = vmatmul.mubr.msk.f32.gmra.mrb[44].mxu1 %vm162_vm0, %v131_v33  ;;  %1977 = vmatprep.mubr.msk.f32.mxu0 %vm162_vm0, %v60_v34 }
  0x66   :  { %2085 = vmatprep.mubr.msk.f32.mxu1 %vm162_vm0, %v132_v35 }
  0x68   :  { %1978 = vmatmul.mubr.msk.f32.gmra.mrb[46].mxu0 %vm162_vm0, %v61_v36 }
  0x69   :  { %2086 = vmatmul.mubr.msk.f32.gmra.mrb[46].mxu1 %vm162_vm0, %v133_v37  ;;  %1980 = vmatprep.mubr.msk.f32.mxu0 %vm162_vm0, %v62_v38 }
  0x6a   :  { %2088 = vmatprep.mubr.msk.f32.mxu1 %vm162_vm0, %v134_v39 }
  0x6c   :  { %1981 = vmatmul.mubr.msk.f32.gmra.mrb[48].mxu0 %vm162_vm0, %v63_v40 }
  0x6d   :  { %2089 = vmatmul.mubr.msk.f32.gmra.mrb[48].mxu1 %vm162_vm0, %v135_v41  ;;  %1983 = vmatprep.mubr.msk.f32.mxu0 %vm162_vm0, %v64_v42 }
  0x6e   :  { %2091 = vmatprep.mubr.msk.f32.mxu1 %vm162_vm0, %v136_v43 }
  0x70   :  { %1984 = vmatmul.mubr.msk.f32.gmra.mrb[50].mxu0 %vm162_vm0, %v65_v44 }
  0x71   :  { %2092 = vmatmul.mubr.msk.f32.gmra.mrb[50].mxu1 %vm162_vm0, %v137_v45  ;;  %1986 = vmatprep.mubr.msk.f32.mxu0 %vm162_vm0, %v66_v46 }
  0x72   :  { %2094 = vmatprep.mubr.msk.f32.mxu1 %vm162_vm0, %v138_v47 }
  0x74   :  { %1987 = vmatmul.mubr.msk.f32.gmra.mrb[52].mxu0 %vm162_vm0, %v67_v48 }
  0x75   :  { %2095 = vmatmul.mubr.msk.f32.gmra.mrb[52].mxu1 %vm162_vm0, %v139_v49  ;;  %1989 = vmatprep.mubr.msk.f32.mxu0 %vm162_vm0, %v68_v50 }
  0x76   :  { %2097 = vmatprep.mubr.msk.f32.mxu1 %vm162_vm0, %v140_v51 }
  0x78   :  { %1990 = vmatmul.mubr.msk.f32.gmra.mrb[54].mxu0 %vm162_vm0, %v69_v52 }
  0x79   :  { %2098 = vmatmul.mubr.msk.f32.gmra.mrb[54].mxu1 %vm162_vm0, %v141_v53  ;;  %1992 = vmatprep.mubr.msk.f32.mxu0 %vm162_vm0, %v70_v54 }
  0x7a   :  { %2100 = vmatprep.mubr.msk.f32.mxu1 %vm162_vm0, %v142_v55 }
  0x7c   :  { %1993 = vmatmul.mubr.msk.f32.gmra.mrb[56].mxu0 %vm162_vm0, %v71_v56 }
  0x7d   :  { %2101 = vmatmul.mubr.msk.f32.gmra.mrb[56].mxu1 %vm162_vm0, %v143_v57  ;;  %1995 = vmatprep.mubr.msk.f32.mxu0 %vm162_vm0, %v72_v58 }
  0x7e   :  { %2103 = vmatprep.mubr.msk.f32.mxu1 %vm162_vm0, %v144_v59 }
  0x80   :  { %1996 = vmatmul.mubr.msk.f32.gmra.mrb[58].mxu0 %vm162_vm0, %v73_v60 }
  0x81   :  { %2104 = vmatmul.mubr.msk.f32.gmra.mrb[58].mxu1 %vm162_vm0, %v145_v61  ;;  %1998 = vmatprep.mubr.msk.f32.mxu0 %vm162_vm0, %v74_v62 }
  0x82   :  { %2106 = vmatprep.mubr.msk.f32.mxu1 %vm162_vm0, %v146_v63 }
  0x84   :  { %1999 = vmatmul.mubr.msk.f32.gmra.mrb[60].mxu0 %vm162_vm0, %v75_v0 }
  0x85   :  { %2107 = vmatmul.mubr.msk.f32.gmra.mrb[60].mxu1 %vm162_vm0, %v147_v1  ;;  %2001 = vmatprep.mubr.msk.f32.mxu0 %vm162_vm0, %v76_v2 }
  0x86   :  { %2109 = vmatprep.mubr.msk.f32.mxu1 %vm162_vm0, %v148_v3 }
  0x88   :  { %2002 = vmatmul.mubr.msk.f32.gmra.mrb[62].mxu0 %vm162_vm0, %v77_v4 }
  0x89   :  { %2110 = vmatmul.mubr.msk.f32.gmra.mrb[62].mxu1 %vm162_vm0, %v149_v5  ;;  %2004 = vmatprep.mubr.msk.f32.mxu0 %vm162_vm0, %v78_v6 }
  0x8a   :  { %2112 = vmatprep.mubr.msk.f32.mxu1 %vm162_vm0, %v150_v7 }
  0x8c   :  { %2005 = vmatmul.mubr.msk.f32.gmra.mrb[64].mxu0 %vm162_vm0, %v79_v8 }
  0x8d   :  { %2113 = vmatmul.mubr.msk.f32.gmra.mrb[64].mxu1 %vm162_vm0, %v151_v9  ;;  %2007 = vmatprep.mubr.msk.f32.mxu0 %vm162_vm0, %v80_v10 }
  0x8e   :  { %2115 = vmatprep.mubr.msk.f32.mxu1 %vm162_vm0, %v152_v11 }
  0x90   :  { %2008 = vmatmul.mubr.msk.f32.gmra.mrb[66].mxu0 %vm162_vm0, %v81_v12 }
  0x91   :  { %2116 = vmatmul.mubr.msk.f32.gmra.mrb[66].mxu1 %vm162_vm0, %v153_v13  ;;  %2010 = vmatprep.mubr.msk.f32.mxu0 %vm162_vm0, %v82_v14 }
  0x92   :  { %2118 = vmatprep.mubr.msk.f32.mxu1 %vm162_vm0, %v154_v15 }
  0x94   :  { %2011 = vmatmul.mubr.msk.f32.gmra.mrb[68].mxu0 %vm162_vm0, %v83_v16 }
  0x95   :  { %2119 = vmatmul.mubr.msk.f32.gmra.mrb[68].mxu1 %vm162_vm0, %v155_v17  ;;  %2013 = vmatprep.mubr.msk.f32.mxu0 %vm162_vm0, %v84_v18 }
  0x96   :  { %2121 = vmatprep.mubr.msk.f32.mxu1 %vm162_vm0, %v156_v19 }
  0x98   :  { %2014 = vmatmul.mubr.msk.f32.gmra.mrb[70].mxu0 %vm162_vm0, %v85_v20 }
  0x99   :  { %2122 = vmatmul.mubr.msk.f32.gmra.mrb[70].mxu1 %vm162_vm0, %v157_v21 }
  0xdf   :  { %v2744_v22 = vpop.f32.mrb[0].mxu0 }
  0xe0   :  { %v2746_v23 = vpop.f32.mrb[0].mxu1  ;;  %v2748_v24 = vpop.f32.mrb[1].mxu0 }
  0xe1   :  { %v2750_v25 = vpop.f32.mrb[1].mxu1 }
  0xe3   :  { %v2752_v26 = vpop.f32.mrb[2].mxu0 }
  0xe4   :  { %v2754_v27 = vpop.f32.mrb[2].mxu1  ;;  %v2756_v28 = vpop.f32.mrb[3].mxu0 }
  0xe5   :  { %v2758_v29 = vpop.f32.mrb[3].mxu1 }
  0xe7   :  { %v2760_v30 = vpop.f32.mrb[4].mxu0 }
  0xe8   :  { %v2762_v31 = vpop.f32.mrb[4].mxu1  ;;  %v2764_v32 = vpop.f32.mrb[5].mxu0 }
  0xe9   :  { %v2766_v33 = vpop.f32.mrb[5].mxu1 }
  0xeb   :  { %v2768_v34 = vpop.f32.mrb[6].mxu0 }
  0xec   :  { %v2770_v35 = vpop.f32.mrb[6].mxu1  ;;  %v2772_v36 = vpop.f32.mrb[7].mxu0 }
  0xed   :  { %v2774_v37 = vpop.f32.mrb[7].mxu1 }
  0xef   :  { %v2776_v38 = vpop.f32.mrb[8].mxu0 }
  0xf0   :  { %v2778_v39 = vpop.f32.mrb[8].mxu1  ;;  %v2780_v40 = vpop.f32.mrb[9].mxu0 }
  0xf1   :  { %v2782_v41 = vpop.f32.mrb[9].mxu1 }
  0xf3   :  { %v2784_v42 = vpop.f32.mrb[10].mxu0 }
  0xf4   :  { %v2786_v43 = vpop.f32.mrb[10].mxu1  ;;  %v2788_v44 = vpop.f32.mrb[11].mxu0 }
  0xf5   :  { %v2790_v45 = vpop.f32.mrb[11].mxu1 }
  0xf7   :  { %v2792_v46 = vpop.f32.mrb[12].mxu0 }
  0xf8   :  { %v2794_v47 = vpop.f32.mrb[12].mxu1  ;;  %v2796_v48 = vpop.f32.mrb[13].mxu0 }
  0xf9   :  { %v2798_v49 = vpop.f32.mrb[13].mxu1 }
  0xfb   :  { %v2800_v50 = vpop.f32.mrb[14].mxu0 }
  0xfc   :  { %v2802_v51 = vpop.f32.mrb[14].mxu1  ;;  %v2804_v52 = vpop.f32.mrb[15].mxu0 }
  0xfd   :  { %v2806_v53 = vpop.f32.mrb[15].mxu1 }
  0xff   :  { %v2808_v54 = vpop.f32.mrb[16].mxu0 }
 0x100   :  { %v2810_v55 = vpop.f32.mrb[16].mxu1  ;;  %v2812_v56 = vpop.f32.mrb[17].mxu0 }
 0x101   :  { %v2814_v57 = vpop.f32.mrb[17].mxu1 }
 0x103   :  { %v2816_v58 = vpop.f32.mrb[18].mxu0 }
 0x104   :  { %v2818_v59 = vpop.f32.mrb[18].mxu1  ;;  %v2820_v60 = vpop.f32.mrb[19].mxu0 }
 0x105   :  { %v2822_v61 = vpop.f32.mrb[19].mxu1 }
 0x107   :  { %v2824_v62 = vpop.f32.mrb[20].mxu0 }
 0x108   :  { %v2826_v63 = vpop.f32.mrb[20].mxu1  ;;  %v2828_v0 = vpop.f32.mrb[21].mxu0 }
 0x109   :  { %v2830_v1 = vpop.f32.mrb[21].mxu1 }
 0x10b   :  { %v2832_v2 = vpop.f32.mrb[22].mxu0 }
 0x10c   :  { %v2834_v3 = vpop.f32.mrb[22].mxu1  ;;  %v2836_v4 = vpop.f32.mrb[23].mxu0 }
 0x10d   :  { %v2838_v5 = vpop.f32.mrb[23].mxu1 }
 0x10f   :  { %v2840_v6 = vpop.f32.mrb[24].mxu0 }
 0x110   :  { %3113 = vst [vmem:[#allocation2_spill] sm:$0xff] %v2840_v6  ;;  %v2842_v7 = vpop.f32.mrb[24].mxu1  ;;  %v2844_v8 = vpop.f32.mrb[25].mxu0 }
 0x111   :  { %3114 = vst [vmem:[#allocation3_spill] sm:$0xff] %v2842_v7  ;;  %3115 = vst [vmem:[#allocation4_spill] sm:$0xff] %v2844_v8  ;;  %v2846_v9 = vpop.f32.mrb[25].mxu1 }
 0x112   :  { %3116 = vst [vmem:[#allocation5_spill] sm:$0xff] %v2846_v9 }
 0x113   :  { %v2848_v10 = vpop.f32.mrb[26].mxu0 }
 0x114   :  { %3117 = vst [vmem:[#allocation6_spill] sm:$0xff] %v2848_v10  ;;  %v2850_v11 = vpop.f32.mrb[26].mxu1  ;;  %v2852_v12 = vpop.f32.mrb[27].mxu0 }
 0x115   :  { %3118 = vst [vmem:[#allocation7_spill] sm:$0xff] %v2850_v11  ;;  %3119 = vst [vmem:[#allocation8_spill] sm:$0xff] %v2852_v12  ;;  %v2854_v13 = vpop.f32.mrb[27].mxu1 }
 0x116   :  { %3120 = vst [vmem:[#allocation9_spill] sm:$0xff] %v2854_v13 }
 0x117   :  { %v2856_v14 = vpop.f32.mrb[28].mxu0 }
 0x118   :  { %3121 = vst [vmem:[#allocation10_spill] sm:$0xff] %v2856_v14  ;;  %v2858_v15 = vpop.f32.mrb[28].mxu1  ;;  %v2860_v16 = vpop.f32.mrb[29].mxu0 }
 0x119   :  { %3122 = vst [vmem:[#allocation11_spill] sm:$0xff] %v2858_v15  ;;  %3123 = vst [vmem:[#allocation12_spill] sm:$0xff] %v2860_v16  ;;  %v2862_v17 = vpop.f32.mrb[29].mxu1 }
 0x11a   :  { %3124 = vst [vmem:[#allocation13_spill] sm:$0xff] %v2862_v17 }
 0x11b   :  { %v2864_v18 = vpop.f32.mrb[30].mxu0 }
 0x11c   :  { %3125 = vst [vmem:[#allocation14_spill] sm:$0xff] %v2864_v18  ;;  %v2866_v19 = vpop.f32.mrb[30].mxu1  ;;  %v2868_v20 = vpop.f32.mrb[31].mxu0 }
 0x11d   :  { %3126 = vst [vmem:[#allocation15_spill] sm:$0xff] %v2866_v19  ;;  %3127 = vst [vmem:[#allocation16_spill] sm:$0xff] %v2868_v20  ;;  %v2870_v21 = vpop.f32.mrb[31].mxu1 }
 0x11e   :  { %3128 = vst [vmem:[#allocation17_spill] sm:$0xff] %v2870_v21 }
 0x11f   :  { %v2872_v11 = vpop.f32.mrb[32].mxu0 }
 0x120   :  { %3129 = vst [vmem:[#allocation18_spill] sm:$0xff] %v2872_v11  ;;  %v2874_v12 = vpop.f32.mrb[32].mxu1  ;;  %v2876_v13 = vpop.f32.mrb[33].mxu0 }
 0x121   :  { %3130 = vst [vmem:[#allocation19_spill] sm:$0xff] %v2874_v12  ;;  %3131 = vst [vmem:[#allocation20_spill] sm:$0xff] %v2876_v13  ;;  %v2878_v14 = vpop.f32.mrb[33].mxu1 }
 0x122   :  { %3132 = vst [vmem:[#allocation21_spill] sm:$0xff] %v2878_v14  ;;  %v2893_v14 = vld [vmem:[%s3111_s2] ss:$0 sm:$0xff] }
 0x123   :  { %v2880_v15 = vpop.f32.mrb[34].mxu0 }
 0x124   :  { %3133 = vst [vmem:[#allocation22_spill] sm:$0xff] %v2880_v15  ;;  %v2882_v16 = vpop.f32.mrb[34].mxu1  ;;  %v2884_v17 = vpop.f32.mrb[35].mxu0 }
 0x125   :  { %3134 = vst [vmem:[#allocation23_spill] sm:$0xff] %v2882_v16  ;;  %3135 = vst [vmem:[#allocation24_spill] sm:$0xff] %v2884_v17  ;;  %v2886_v18 = vpop.f32.mrb[35].mxu1 }
 0x126   :  { %3136 = vst [vmem:[#allocation25_spill] sm:$0xff] %v2886_v18 }
 0x127   :  { %v1964_v19 = vpop.f32.mrb[36].mxu0 }
 0x128   :  { %v2072_v20 = vpop.f32.mrb[36].mxu1  ;;  %v1381_v21 = vmax.f32 %v2744_v22, %v1964_v19  ;;  %v841_v10 = vpop.f32.mrb[37].mxu0 }
 0x129   :  { %v1417_v11 = vmax.f32 %v2746_v23, %v2072_v20  ;;  %v1201_v12 = vpop.f32.mrb[37].mxu1  ;;  %v1380_v15 = vmax.f32 %v2748_v24, %v841_v10 }
 0x12a   :  { %v1416_v16 = vmax.f32 %v2750_v25, %v1201_v12 }
 0x12b   :  { %v1453_v17 = vmax.f32 %v1381_v21, %v1417_v11  ;;  %v1967_v18 = vpop.f32.mrb[38].mxu0 }
 0x12c   :  { %v1452_v13 = vmax.f32 %v1380_v15, %v1416_v16  ;;  %v2075_v9 = vpop.f32.mrb[38].mxu1  ;;  %v1383_v22 = vmax.f32 %v2752_v26, %v1967_v18  ;;  %v851_v19 = vpop.f32.mrb[39].mxu0 }
 0x12d   :  { %v1496_v8 = vadd.f32 %v2893_v14, %v1453_v17  ;;  %v1419_v23 = vmax.f32 %v2754_v27, %v2075_v9  ;;  %v1211_v20 = vpop.f32.mrb[39].mxu1  ;;  %v1382_v6 = vmax.f32 %v2756_v28, %v851_v19 }
 0x12e   :  { %v1495_v7 = vadd.f32 %v2893_v14, %v1452_v13  ;;  %v1418_v24 = vmax.f32 %v2758_v29, %v1211_v20 }
 0x12f   :  { %v1532_v10 = vmax.f32 %v1496_v8, 0.0  ;;  %v1455_v25 = vmax.f32 %v1383_v22, %v1419_v23  ;;  %v1970_v15 = vpop.f32.mrb[40].mxu0 }
 0x130   :  { %v1531_v11 = vmax.f32 %v1495_v7, 0.0  ;;  %v1454_v12 = vmax.f32 %v1382_v6, %v1418_v24  ;;  %v2078_v16 = vpop.f32.mrb[40].mxu1  ;;  %v1385_v27 = vmax.f32 %v2760_v30, %v1970_v15  ;;  %v861_v13 = vpop.f32.mrb[41].mxu0 }
 0x131   :  { %1568 = vst [vmem:[%s3112_s3 + $0x8] sm:$0xff] %v1532_v10  ;;  %v1498_v26 = vadd.f32 %v2893_v14, %v1455_v25  ;;  %v1421_v9 = vmax.f32 %v2762_v31, %v2078_v16  ;;  %v1221_v28 = vpop.f32.mrb[41].mxu1  ;;  %v1384_v6 = vmax.f32 %v2764_v32, %v861_v13 }
 0x132   :  { %1567 = vst [vmem:[%s3112_s3] sm:$0xff] %v1531_v11  ;;  %v1497_v29 = vadd.f32 %v2893_v14, %v1454_v12  ;;  %v1420_v7 = vmax.f32 %v2766_v33, %v1221_v28 }
 0x133   :  { %v1534_v8 = vmax.f32 %v1498_v26, 0.0  ;;  %v1457_v17 = vmax.f32 %v1385_v27, %v1421_v9  ;;  %v1973_v22 = vpop.f32.mrb[42].mxu0 }
 0x134   :  { %v1533_v18 = vmax.f32 %v1497_v29, 0.0  ;;  %v1456_v21 = vmax.f32 %v1384_v6, %v1420_v7  ;;  %v2081_v30 = vpop.f32.mrb[42].mxu1  ;;  %v1387_v23 = vmax.f32 %v2768_v34, %v1973_v22  ;;  %v871_v20 = vpop.f32.mrb[43].mxu0 }
 0x135   :  { %1570 = vst [vmem:[%s3112_s3 + $0x18] sm:$0xff] %v1534_v8  ;;  %v1500_v31 = vadd.f32 %v2893_v14, %v1457_v17  ;;  %v1423_v19 = vmax.f32 %v2770_v35, %v2081_v30  ;;  %v1231_v32 = vpop.f32.mrb[43].mxu1  ;;  %v1386_v24 = vmax.f32 %v2772_v36, %v871_v20 }
 0x136   :  { %1569 = vst [vmem:[%s3112_s3 + $0x10] sm:$0xff] %v1533_v18  ;;  %v1499_v33 = vadd.f32 %v2893_v14, %v1456_v21  ;;  %v1422_v10 = vmax.f32 %v2774_v37, %v1231_v32 }
 0x137   :  { %v1536_v25 = vmax.f32 %v1500_v31, 0.0  ;;  %v1459_v11 = vmax.f32 %v1387_v23, %v1423_v19  ;;  %v1976_v16 = vpop.f32.mrb[44].mxu0 }
 0x138   :  { %v1535_v12 = vmax.f32 %v1499_v33, 0.0  ;;  %v1458_v15 = vmax.f32 %v1386_v24, %v1422_v10  ;;  %v2084_v34 = vpop.f32.mrb[44].mxu1  ;;  %v1389_v26 = vmax.f32 %v2776_v38, %v1976_v16  ;;  %v881_v9 = vpop.f32.mrb[45].mxu0 }
 0x139   :  { %1572 = vst [vmem:[%s3112_s3 + $0x28] sm:$0xff] %v1536_v25  ;;  %v1502_v35 = vadd.f32 %v2893_v14, %v1459_v11  ;;  %v1425_v27 = vmax.f32 %v2778_v39, %v2084_v34  ;;  %v1241_v36 = vpop.f32.mrb[45].mxu1  ;;  %v1388_v13 = vmax.f32 %v2780_v40, %v881_v9 }
 0x13a   :  { %1571 = vst [vmem:[%s3112_s3 + $0x20] sm:$0xff] %v1535_v12  ;;  %v1501_v37 = vadd.f32 %v2893_v14, %v1458_v15  ;;  %v1424_v28 = vmax.f32 %v2782_v41, %v1241_v36 }
 0x13b   :  { %v1538_v29 = vmax.f32 %v1502_v35, 0.0  ;;  %v1461_v6 = vmax.f32 %v1389_v26, %v1425_v27  ;;  %v1979_v17 = vpop.f32.mrb[46].mxu0 }
 0x13c   :  { %v1537_v7 = vmax.f32 %v1501_v37, 0.0  ;;  %v1460_v8 = vmax.f32 %v1388_v13, %v1424_v28  ;;  %v2087_v38 = vpop.f32.mrb[46].mxu1  ;;  %v1391_v18 = vmax.f32 %v2784_v42, %v1979_v17  ;;  %v891_v22 = vpop.f32.mrb[47].mxu0 }
 0x13d   :  { %1574 = vst [vmem:[%s3112_s3 + $0x38] sm:$0xff] %v1538_v29  ;;  %v1504_v39 = vadd.f32 %v2893_v14, %v1461_v6  ;;  %v1427_v21 = vmax.f32 %v2786_v43, %v2087_v38  ;;  %v1251_v40 = vpop.f32.mrb[47].mxu1  ;;  %v1390_v30 = vmax.f32 %v2788_v44, %v891_v22 }
 0x13e   :  { %1573 = vst [vmem:[%s3112_s3 + $0x30] sm:$0xff] %v1537_v7  ;;  %v1503_v41 = vadd.f32 %v2893_v14, %v1460_v8  ;;  %v1426_v31 = vmax.f32 %v2790_v45, %v1251_v40 }
 0x13f   :  { %v1540_v23 = vmax.f32 %v1504_v39, 0.0  ;;  %v1463_v19 = vmax.f32 %v1391_v18, %v1427_v21  ;;  %v1982_v33 = vpop.f32.mrb[48].mxu0 }
 0x140   :  { %v1539_v20 = vmax.f32 %v1503_v41, 0.0  ;;  %v1462_v32 = vmax.f32 %v1390_v30, %v1426_v31  ;;  %v2090_v42 = vpop.f32.mrb[48].mxu1  ;;  %v1393_v24 = vmax.f32 %v2792_v46, %v1982_v33  ;;  %v901_v25 = vpop.f32.mrb[49].mxu0 }
 0x141   :  { %1576 = vst [vmem:[%s3112_s3 + $0x48] sm:$0xff] %v1540_v23  ;;  %v1506_v43 = vadd.f32 %v2893_v14, %v1463_v19  ;;  %v1429_v10 = vmax.f32 %v2794_v47, %v2090_v42  ;;  %v1261_v44 = vpop.f32.mrb[49].mxu1  ;;  %v1392_v11 = vmax.f32 %v2796_v48, %v901_v25 }
 0x142   :  { %1575 = vst [vmem:[%s3112_s3 + $0x40] sm:$0xff] %v1539_v20  ;;  %v1505_v45 = vadd.f32 %v2893_v14, %v1462_v32  ;;  %v1428_v12 = vmax.f32 %v2798_v49, %v1261_v44 }
 0x143   :  { %v1542_v15 = vmax.f32 %v1506_v43, 0.0  ;;  %v1465_v16 = vmax.f32 %v1393_v24, %v1429_v10  ;;  %v1985_v26 = vpop.f32.mrb[50].mxu0 }
 0x144   :  { %v1541_v34 = vmax.f32 %v1505_v45, 0.0  ;;  %v1464_v35 = vmax.f32 %v1392_v11, %v1428_v12  ;;  %v2093_v46 = vpop.f32.mrb[50].mxu1  ;;  %v1395_v27 = vmax.f32 %v2800_v50, %v1985_v26  ;;  %v911_v36 = vpop.f32.mrb[51].mxu0 }
 0x145   :  { %1578 = vst [vmem:[%s3112_s3 + $0x58] sm:$0xff] %v1542_v15  ;;  %v1508_v47 = vadd.f32 %v2893_v14, %v1465_v16  ;;  %v1431_v9 = vmax.f32 %v2802_v51, %v2093_v46  ;;  %v1271_v48 = vpop.f32.mrb[51].mxu1  ;;  %v1394_v37 = vmax.f32 %v2804_v52, %v911_v36 }
 0x146   :  { %1577 = vst [vmem:[%s3112_s3 + $0x50] sm:$0xff] %v1541_v34  ;;  %v1507_v49 = vadd.f32 %v2893_v14, %v1464_v35  ;;  %v1430_v13 = vmax.f32 %v2806_v53, %v1271_v48 }
 0x147   :  { %v1544_v28 = vmax.f32 %v1508_v47, 0.0  ;;  %v1467_v29 = vmax.f32 %v1395_v27, %v1431_v9  ;;  %v1988_v8 = vpop.f32.mrb[52].mxu0 }
 0x148   :  { %v1543_v6 = vmax.f32 %v1507_v49, 0.0  ;;  %v1466_v7 = vmax.f32 %v1394_v37, %v1430_v13  ;;  %v2096_v50 = vpop.f32.mrb[52].mxu1  ;;  %v1397_v17 = vmax.f32 %v2808_v54, %v1988_v8  ;;  %v921_v39 = vpop.f32.mrb[53].mxu0  ;;  %v3138_v8 = vld [vmem:[#allocation3_spill] sm:$0xff] }
 0x149   :  { %1580 = vst [vmem:[%s3112_s3 + $0x68] sm:$0xff] %v1544_v28  ;;  %v1510_v51 = vadd.f32 %v2893_v14, %v1467_v29  ;;  %v1433_v38 = vmax.f32 %v2810_v55, %v2096_v50  ;;  %v1281_v52 = vpop.f32.mrb[53].mxu1  ;;  %v1396_v18 = vmax.f32 %v2812_v56, %v921_v39  ;;  %v3140_v39 = vld [vmem:[#allocation5_spill] sm:$0xff] }
 0x14a   :  { %1579 = vst [vmem:[%s3112_s3 + $0x60] sm:$0xff] %v1543_v6  ;;  %v1509_v53 = vadd.f32 %v2893_v14, %v1466_v7  ;;  %v1432_v21 = vmax.f32 %v2814_v57, %v1281_v52  ;;  %v3137_v6 = vld [vmem:[#allocation2_spill] sm:$0xff] }
 0x14b   :  { %v1546_v22 = vmax.f32 %v1510_v51, 0.0  ;;  %v1469_v40 = vmax.f32 %v1397_v17, %v1433_v38  ;;  %v1991_v31 = vpop.f32.mrb[54].mxu0  ;;  %v3139_v17 = vld [vmem:[#allocation4_spill] sm:$0xff] }
 0x14c   :  { %v1545_v41 = vmax.f32 %v1509_v53, 0.0  ;;  %v1468_v30 = vmax.f32 %v1396_v18, %v1432_v21  ;;  %v2099_v54 = vpop.f32.mrb[54].mxu1  ;;  %v1399_v23 = vmax.f32 %v2816_v58, %v1991_v31  ;;  %v931_v20 = vpop.f32.mrb[55].mxu0  ;;  %v3141_v31 = vld [vmem:[#allocation6_spill] sm:$0xff] }
 0x14d   :  { %1582 = vst [vmem:[%s3112_s3 + $0x78] sm:$0xff] %v1546_v22  ;;  %v1512_v55 = vadd.f32 %v2893_v14, %v1469_v40  ;;  %v1435_v19 = vmax.f32 %v2818_v59, %v2099_v54  ;;  %v1291_v56 = vpop.f32.mrb[55].mxu1  ;;  %v1398_v32 = vmax.f32 %v2820_v60, %v931_v20 }
 0x14e   :  { %1581 = vst [vmem:[%s3112_s3 + $0x70] sm:$0xff] %v1545_v41  ;;  %v1511_v57 = vadd.f32 %v2893_v14, %v1468_v30  ;;  %v1434_v33 = vmax.f32 %v2822_v61, %v1291_v56 }
 0x14f   :  { %v1548_v42 = vmax.f32 %v1512_v55, 0.0  ;;  %v1471_v43 = vmax.f32 %v1399_v23, %v1435_v19  ;;  %v1994_v25 = vpop.f32.mrb[56].mxu0  ;;  %v3142_v55 = vld [vmem:[#allocation7_spill] sm:$0xff] }
 0x150   :  { %v1547_v24 = vmax.f32 %v1511_v57, 0.0  ;;  %v1470_v10 = vmax.f32 %v1398_v32, %v1434_v33  ;;  %v2102_v58 = vpop.f32.mrb[56].mxu1  ;;  %v1401_v44 = vmax.f32 %v2824_v62, %v1994_v25  ;;  %v941_v11 = vpop.f32.mrb[57].mxu0  ;;  %v3143_v57 = vld [vmem:[#allocation8_spill] sm:$0xff]  ;;  %v3144_v33 = vld [vmem:[#allocation9_spill] sm:$0xff] }
 0x151   :  { %1584 = vst [vmem:[%s3112_s3 + $0x88] sm:$0xff] %v1548_v42  ;;  %v1514_v59 = vadd.f32 %v2893_v14, %v1471_v43  ;;  %v1437_v45 = vmax.f32 %v2826_v63, %v2102_v58  ;;  %v1301_v60 = vpop.f32.mrb[57].mxu1  ;;  %v1400_v12 = vmax.f32 %v2828_v0, %v941_v11 }
 0x152   :  { %1583 = vst [vmem:[%s3112_s3 + $0x80] sm:$0xff] %v1547_v24  ;;  %v1513_v61 = vadd.f32 %v2893_v14, %v1470_v10  ;;  %v1436_v15 = vmax.f32 %v2830_v1, %v1301_v60  ;;  %v3146_v60 = vld [vmem:[#allocation11_spill] sm:$0xff] }
 0x153   :  { %v1550_v16 = vmax.f32 %v1514_v59, 0.0  ;;  %v1473_v34 = vmax.f32 %v1401_v44, %v1437_v45  ;;  %v1997_v46 = vpop.f32.mrb[58].mxu0  ;;  %v3145_v45 = vld [vmem:[#allocation10_spill] sm:$0xff] }
 0x154   :  { %v1549_v35 = vmax.f32 %v1513_v61, 0.0  ;;  %v1472_v26 = vmax.f32 %v1400_v12, %v1436_v15  ;;  %v2105_v62 = vpop.f32.mrb[58].mxu1  ;;  %v1403_v47 = vmax.f32 %v2832_v2, %v1997_v46  ;;  %v951_v9 = vpop.f32.mrb[59].mxu0 }
 0x155   :  { %1586 = vst [vmem:[%s3112_s3 + $0x98] sm:$0xff] %v1550_v16  ;;  %v1516_v63 = vadd.f32 %v2893_v14, %v1473_v34  ;;  %v1439_v27 = vmax.f32 %v2834_v3, %v2105_v62  ;;  %v1311_v0 = vpop.f32.mrb[59].mxu1  ;;  %v1402_v36 = vmax.f32 %v2836_v4, %v951_v9  ;;  %v3147_v34 = vld [vmem:[#allocation12_spill] sm:$0xff] }
 0x156   :  { %1585 = vst [vmem:[%s3112_s3 + $0x90] sm:$0xff] %v1549_v35  ;;  %v1515_v1 = vadd.f32 %v2893_v14, %v1472_v26  ;;  %v1438_v48 = vmax.f32 %v2838_v5, %v1311_v0  ;;  %v3148_v26 = vld [vmem:[#allocation13_spill] sm:$0xff] }
 0x157   :  { %v1552_v49 = vmax.f32 %v1516_v63, 0.0  ;;  %v1475_v37 = vmax.f32 %v1403_v47, %v1439_v27  ;;  %v2000_v29 = vpop.f32.mrb[60].mxu0 }
 0x158   :  { %v1551_v13 = vmax.f32 %v1515_v1, 0.0  ;;  %v1474_v28 = vmax.f32 %v1402_v36, %v1438_v48  ;;  %v2108_v2 = vpop.f32.mrb[60].mxu1  ;;  %v1405_v7 = vmax.f32 %v3137_v6, %v2000_v29  ;;  %v961_v51 = vpop.f32.mrb[61].mxu0  ;;  %v3149_v36 = vld [vmem:[#allocation14_spill] sm:$0xff]  ;;  %v3152_v6 = vld [vmem:[#allocation17_spill] sm:$0xff] }
 0x159   :  { %1588 = vst [vmem:[%s3112_s3 + $0xa8] sm:$0xff] %v1552_v49  ;;  %v1518_v3 = vadd.f32 %v2893_v14, %v1475_v37  ;;  %v1441_v50 = vmax.f32 %v3138_v8, %v2108_v2  ;;  %v1321_v4 = vpop.f32.mrb[61].mxu1  ;;  %v1404_v38 = vmax.f32 %v3139_v17, %v961_v51  ;;  %v3150_v49 = vld [vmem:[#allocation15_spill] sm:$0xff]  ;;  %v3151_v2 = vld [vmem:[#allocation16_spill] sm:$0xff] }
 0x15a   :  { %1587 = vst [vmem:[%s3112_s3 + $0xa0] sm:$0xff] %v1551_v13  ;;  %v1517_v5 = vadd.f32 %v2893_v14, %v1474_v28  ;;  %v1440_v52 = vmax.f32 %v3140_v39, %v1321_v4  ;;  %v3153_v39 = vld [vmem:[#allocation18_spill] sm:$0xff] }
 0x15b   :  { %v1554_v53 = vmax.f32 %v1518_v3, 0.0  ;;  %v1477_v18 = vmax.f32 %v1405_v7, %v1441_v50  ;;  %v2003_v40 = vpop.f32.mrb[62].mxu0 }
 0x15c   :  { %v1553_v21 = vmax.f32 %v1517_v5, 0.0  ;;  %v1476_v22 = vmax.f32 %v1404_v38, %v1440_v52  ;;  %v2111_v41 = vpop.f32.mrb[62].mxu1  ;;  %v1407_v54 = vmax.f32 %v3141_v31, %v2003_v40  ;;  %v971_v19 = vpop.f32.mrb[63].mxu0  ;;  %v3156_v31 = vld [vmem:[#allocation21_spill] sm:$0xff] }
 0x15d   :  { %1590 = vst [vmem:[%s3112_s3 + $0xb8] sm:$0xff] %v1554_v53  ;;  %v1520_v30 = vadd.f32 %v2893_v14, %v1477_v18  ;;  %v1443_v23 = vmax.f32 %v3142_v55, %v2111_v41  ;;  %v1331_v20 = vpop.f32.mrb[63].mxu1  ;;  %v1406_v32 = vmax.f32 %v3143_v57, %v971_v19  ;;  %v3154_v53 = vld [vmem:[#allocation19_spill] sm:$0xff]  ;;  %v3155_v41 = vld [vmem:[#allocation20_spill] sm:$0xff] }
 0x15e   :  { %1589 = vst [vmem:[%s3112_s3 + $0xb0] sm:$0xff] %v1553_v21  ;;  %v1519_v56 = vadd.f32 %v2893_v14, %v1476_v22  ;;  %v1442_v42 = vmax.f32 %v3144_v33, %v1331_v20  ;;  %v3157_v33 = vld [vmem:[#allocation22_spill] sm:$0xff] }
 0x15f   :  { %v1556_v43 = vmax.f32 %v1520_v30, 0.0  ;;  %v1479_v24 = vmax.f32 %v1407_v54, %v1443_v23  ;;  %v2006_v58 = vpop.f32.mrb[64].mxu0 }
 0x160   :  { %v1555_v10 = vmax.f32 %v1519_v56, 0.0  ;;  %v1478_v25 = vmax.f32 %v1406_v32, %v1442_v42  ;;  %v2114_v59 = vpop.f32.mrb[64].mxu1  ;;  %v1409_v11 = vmax.f32 %v3145_v45, %v2006_v58  ;;  %v981_v12 = vpop.f32.mrb[65].mxu0  ;;  %v3160_v45 = vld [vmem:[#allocation25_spill] sm:$0xff] }
 0x161   :  { %1592 = vst [vmem:[%s3112_s3 + $0xc8] sm:$0xff] %v1556_v43  ;;  %v1522_v44 = vadd.f32 %v2893_v14, %v1479_v24  ;;  %v1445_v61 = vmax.f32 %v3146_v60, %v2114_v59  ;;  %v1341_v15 = vpop.f32.mrb[65].mxu1  ;;  %v1408_v35 = vmax.f32 %v3147_v34, %v981_v12  ;;  %v3158_v43 = vld [vmem:[#allocation23_spill] sm:$0xff]  ;;  %v3159_v59 = vld [vmem:[#allocation24_spill] sm:$0xff] }
 0x162   :  { %1591 = vst [vmem:[%s3112_s3 + $0xc0] sm:$0xff] %v1555_v10  ;;  %v1521_v16 = vadd.f32 %v2893_v14, %v1478_v25  ;;  %v1444_v46 = vmax.f32 %v3148_v26, %v1341_v15 }
 0x163   :  { %v1558_v62 = vmax.f32 %v1522_v44, 0.0  ;;  %v1481_v63 = vmax.f32 %v1409_v11, %v1445_v61  ;;  %v2009_v9 = vpop.f32.mrb[66].mxu0 }
 0x164   :  { %v1557_v47 = vmax.f32 %v1521_v16, 0.0  ;;  %v1480_v27 = vmax.f32 %v1408_v35, %v1444_v46  ;;  %v2117_v0 = vpop.f32.mrb[66].mxu1  ;;  %v1411_v48 = vmax.f32 %v3149_v36, %v2009_v9  ;;  %v991_v13 = vpop.f32.mrb[67].mxu0 }
 0x165   :  { %1594 = vst [vmem:[%s3112_s3 + $0xd8] sm:$0xff] %v1558_v62  ;;  %v1524_v1 = vadd.f32 %v2893_v14, %v1481_v63  ;;  %v1447_v37 = vmax.f32 %v3150_v49, %v2117_v0  ;;  %v1351_v28 = vpop.f32.mrb[67].mxu1  ;;  %v1410_v3 = vmax.f32 %v3151_v2, %v991_v13 }
 0x166   :  { %1593 = vst [vmem:[%s3112_s3 + $0xd0] sm:$0xff] %v1557_v47  ;;  %v1523_v29 = vadd.f32 %v2893_v14, %v1480_v27  ;;  %v1446_v7 = vmax.f32 %v3152_v6, %v1351_v28 }
 0x167   :  { %v1560_v8 = vmax.f32 %v1524_v1, 0.0  ;;  %v1483_v50 = vmax.f32 %v1411_v48, %v1447_v37  ;;  %v2012_v5 = vpop.f32.mrb[68].mxu0 }
 0x168   :  { %v1559_v51 = vmax.f32 %v1523_v29, 0.0  ;;  %v1482_v4 = vmax.f32 %v1410_v3, %v1446_v7  ;;  %v2120_v17 = vpop.f32.mrb[68].mxu1  ;;  %v1413_v52 = vmax.f32 %v3153_v39, %v2012_v5  ;;  %v1001_v21 = vpop.f32.mrb[69].mxu0 }
 0x169   :  { %1596 = vst [vmem:[%s3112_s3 + $0xe8] sm:$0xff] %v1560_v8  ;;  %v1526_v38 = vadd.f32 %v2893_v14, %v1483_v50  ;;  %v1449_v18 = vmax.f32 %v3154_v53, %v2120_v17  ;;  %v1361_v22 = vpop.f32.mrb[69].mxu1  ;;  %v1412_v30 = vmax.f32 %v3155_v41, %v1001_v21 }
 0x16a   :  { %1595 = vst [vmem:[%s3112_s3 + $0xe0] sm:$0xff] %v1559_v51  ;;  %v1525_v40 = vadd.f32 %v2893_v14, %v1482_v4  ;;  %v1448_v54 = vmax.f32 %v3156_v31, %v1361_v22 }
 0x16b   :  { %v1562_v55 = vmax.f32 %v1526_v38, 0.0  ;;  %v1485_v23 = vmax.f32 %v1413_v52, %v1449_v18  ;;  %v2015_v56 = vpop.f32.mrb[70].mxu0 }
 0x16c   :  { %v1561_v19 = vmax.f32 %v1525_v40, 0.0  ;;  %v1484_v20 = vmax.f32 %v1412_v30, %v1448_v54  ;;  %v2123_v57 = vpop.f32.mrb[70].mxu1  ;;  %v1415_v42 = vmax.f32 %v3157_v33, %v2015_v56  ;;  %v1011_v10 = vpop.f32.mrb[71].mxu0 }
 0x16d   :  { %1598 = vst [vmem:[%s3112_s3 + $0xf8] sm:$0xff] %v1562_v55  ;;  %v1528_v32 = vadd.f32 %v2893_v14, %v1485_v23  ;;  %v1451_v24 = vmax.f32 %v3158_v43, %v2123_v57  ;;  %v1371_v25 = vpop.f32.mrb[71].mxu1  ;;  %v1414_v44 = vmax.f32 %v3159_v59, %v1011_v10 }
 0x16e   :  { %1597 = vst [vmem:[%s3112_s3 + $0xf0] sm:$0xff] %v1561_v19  ;;  %v1527_v58 = vadd.f32 %v2893_v14, %v1484_v20  ;;  %v1450_v11 = vmax.f32 %v3160_v45, %v1371_v25 }
 0x16f   :  { %v1564_v60 = vmax.f32 %v1528_v32, 0.0  ;;  %v1487_v61 = vmax.f32 %v1415_v42, %v1451_v24 }
 0x170   :  { %v1563_v12 = vmax.f32 %v1527_v58, 0.0  ;;  %v1486_v15 = vmax.f32 %v1414_v44, %v1450_v11 }
 0x171   :  { %1600 = vst [vmem:[%s3112_s3 + $0x108] sm:$0xff] %v1564_v60  ;;  %v1530_v16 = vadd.f32 %v2893_v14, %v1487_v61 }
 0x172   :  { %1599 = vst [vmem:[%s3112_s3 + $0x100] sm:$0xff] %v1563_v12  ;;  %v1529_v34 = vadd.f32 %v2893_v14, %v1486_v15 }
 0x173   :  { %v1566_v35 = vmax.f32 %v1530_v16, 0.0 }
 0x174   :  { %v1565_v26 = vmax.f32 %v1529_v34, 0.0 }
 0x175   :  { %1602 = vst [vmem:[%s3112_s3 + $0x118] sm:$0xff] %v1566_v35 }
 0x176   :  { %1601 = vst [vmem:[%s3112_s3 + $0x110] sm:$0xff] %v1565_v26 }

// kernel: net_forward.4
= control target key start
LH: loop header
LB: loop body
LE: loop exit
PB: predicated region body
PF: predicated region fallthrough
CT: control target
= control target key end

     0   :  { %s614_s1 = inlined_call_operand.vmem [shape: f32[256,128], index: 1, kind: input, shape index: {}]   ;;  %s615_s0 = inlined_call_operand.vmem [shape: f32[4,32,256], index: 0, kind: input, shape index: {}]   ;;  %s616_s2 = inlined_call_operand.vmem [shape: f32[1,128], index: 2, kind: input, shape index: {}]   ;;  %s617_s3 = inlined_call_operand.vmem [shape: f32[32,128], index: 3, kind: output, shape index: {}]  }
   0x1   :  { %v62_v0 = vld [vmem:[%s614_s1 + $0x80] sm:$0xff]  ;;  %v63_v1 = vld [vmem:[%s614_s1 + $0x88] sm:$0xff]  ;;  %v64_v5 = vld [vmem:[%s614_s1 + $0x90] sm:$0xff] }
   0x2   :  { %v46_v2 = vld [vmem:[%s614_s1] sm:$0xff]  ;;  %v339_v3 = vpack.c.bf16 %v63_v1, %v62_v0  ;;  %v47_v4 = vld [vmem:[%s614_s1 + $0x8] sm:$0xff]  ;;  %v65_v6 = vld [vmem:[%s614_s1 + $0x98] sm:$0xff] }
   0x3   :  { %v341_v7 = vpack.c.bf16 %v47_v4, %v46_v2  ;;  %v343_v8 = vpack.c.bf16 %v65_v6, %v64_v5  ;;  %v48_v9 = vld [vmem:[%s614_s1 + $0x10] sm:$0xff]  ;;  %v49_v10 = vld [vmem:[%s614_s1 + $0x18] sm:$0xff]  ;;  %v66_v11 = vld [vmem:[%s614_s1 + $0xa0] sm:$0xff] }
   0x4   :  { %340 = vmatprep.subr.bf16.mxu0 %v339_v3  ;;  %371 = vmatprep.subr.bf16.mxu1 %v339_v3  ;;  %v67_v12 = vld [vmem:[%s614_s1 + $0xa8] sm:$0xff]  ;;  %v345_v13 = vpack.c.bf16 %v49_v10, %v48_v9  ;;  %v50_v15 = vld [vmem:[%s614_s1 + $0x20] sm:$0xff]  ;;  %v68_v17 = vld [vmem:[%s614_s1 + $0xb0] sm:$0xff] }
   0x5   :  { %342 = vmatpush3.bf16.msra.mxu0 %v341_v7  ;;  %379 = vmatpush3.bf16.msra.mxu1 %v341_v7  ;;  %v347_v14 = vpack.c.bf16 %v67_v12, %v66_v11  ;;  %v51_v16 = vld [vmem:[%s614_s1 + $0x28] sm:$0xff]  ;;  %v69_v18 = vld [vmem:[%s614_s1 + $0xb8] sm:$0xff]  ;;  %v52_v21 = vld [vmem:[%s614_s1 + $0x30] sm:$0xff] }
   0x6   :  { %344 = vmatprep.subr.bf16.mxu0 %v343_v8  ;;  %372 = vmatprep.subr.bf16.mxu1 %v343_v8  ;;  %v349_v19 = vpack.c.bf16 %v51_v16, %v50_v15  ;;  %v351_v20 = vpack.c.bf16 %v69_v18, %v68_v17  ;;  %v53_v22 = vld [vmem:[%s614_s1 + $0x38] sm:$0xff]  ;;  %v70_v23 = vld [vmem:[%s614_s1 + $0xc0] sm:$0xff]  ;;  %v71_v24 = vld [vmem:[%s614_s1 + $0xc8] sm:$0xff] }
   0x7   :  { %v15_v25 = vld [vmem:[%s615_s0 + $0x8] sm:$0xff]  ;;  %v353_v27 = vpack.c.bf16 %v53_v22, %v52_v21  ;;  %v355_v28 = vpack.c.bf16 %v71_v24, %v70_v23  ;;  %v54_v29 = vld [vmem:[%s614_s1 + $0x40] sm:$0xff]  ;;  %v72_v31 = vld [vmem:[%s614_s1 + $0xd0] sm:$0xff] }
   0x8   :  { %142 = vmatprep.mubr.f32.mxu0 %v15_v25  ;;  %v31_v26 = vld [vmem:[%s615_s0 + $0x88] sm:$0xff]  ;;  %v73_v32 = vld [vmem:[%s614_s1 + $0xd8] sm:$0xff]  ;;  %v56_v35 = vld [vmem:[%s614_s1 + $0x50] sm:$0xff] }
   0x9   :  { %346 = vmatpush3.bf16.msra.mxu0 %v345_v13  ;;  %380 = vmatpush3.bf16.msra.mxu1 %v345_v13  ;;  %v55_v30 = vld [vmem:[%s614_s1 + $0x48] sm:$0xff]  ;;  %v359_v34 = vpack.c.bf16 %v73_v32, %v72_v31  ;;  %v57_v36 = vld [vmem:[%s614_s1 + $0x58] sm:$0xff]  ;;  %v74_v37 = vld [vmem:[%s614_s1 + $0xe0] sm:$0xff] }
   0xa   :  { %348 = vmatprep.subr.bf16.mxu0 %v347_v14  ;;  %373 = vmatprep.subr.bf16.mxu1 %v347_v14  ;;  %v357_v33 = vpack.c.bf16 %v55_v30, %v54_v29  ;;  %v75_v38 = vld [vmem:[%s614_s1 + $0xe8] sm:$0xff]  ;;  %v361_v39 = vpack.c.bf16 %v57_v36, %v56_v35  ;;  %v58_v41 = vld [vmem:[%s614_s1 + $0x60] sm:$0xff]  ;;  %v76_v43 = vld [vmem:[%s614_s1 + $0xf0] sm:$0xff] }
   0xb   :  { %182 = vmatprep.mubr.f32.mxu1 %v31_v26  ;;  %v363_v40 = vpack.c.bf16 %v75_v38, %v74_v37  ;;  %v59_v42 = vld [vmem:[%s614_s1 + $0x68] sm:$0xff]  ;;  %v77_v44 = vld [vmem:[%s614_s1 + $0xf8] sm:$0xff]  ;;  %v60_v47 = vld [vmem:[%s614_s1 + $0x70] sm:$0xff] }
   0xc   :  { %v365_v45 = vpack.c.bf16 %v59_v42, %v58_v41  ;;  %v367_v46 = vpack.c.bf16 %v77_v44, %v76_v43  ;;  %v61_v48 = vld [vmem:[%s614_s1 + $0x78] sm:$0xff]  ;;  %v14_v50 = vld [vmem:[%s615_s0] sm:$0xff]  ;;  %v16_v54 = vld [vmem:[%s615_s0 + $0x10] sm:$0xff] }
   0xd   :  { %350 = vmatpush3.bf16.msra.mxu0 %v349_v19  ;;  %381 = vmatpush3.bf16.msra.mxu1 %v349_v19  ;;  %v369_v49 = vpack.c.bf16 %v61_v48, %v60_v47  ;;  %v30_v51 = vld [vmem:[%s615_s0 + $0x80] sm:$0xff]  ;;  %v17_v52 = vld [vmem:[%s615_s0 + $0x18] sm:$0xff]  ;;  %v32_v55 = vld [vmem:[%s615_s0 + $0x90] sm:$0xff] }
   0xe   :  { %352 = vmatprep.subr.bf16.mxu0 %v351_v20  ;;  %374 = vmatprep.subr.bf16.mxu1 %v351_v20  ;;  %v33_v53 = vld [vmem:[%s615_s0 + $0x98] sm:$0xff]  ;;  %v19_v56 = vld [vmem:[%s615_s0 + $0x28] sm:$0xff]  ;;  %v18_v58 = vld [vmem:[%s615_s0 + $0x20] sm:$0xff] }
   0xf   :  { %v35_v57 = vld [vmem:[%s615_s0 + $0xa8] sm:$0xff]  ;;  %v34_v59 = vld [vmem:[%s615_s0 + $0xa0] sm:$0xff]  ;;  %v21_v60 = vld [vmem:[%s615_s0 + $0x38] sm:$0xff] }
  0x10   :  { %v37_v61 = vld [vmem:[%s615_s0 + $0xb8] sm:$0xff]  ;;  %v20_v62 = vld [vmem:[%s615_s0 + $0x30] sm:$0xff]  ;;  %v23_v0 = vld [vmem:[%s615_s0 + $0x48] sm:$0xff] }
  0x11   :  { %354 = vmatpush3.bf16.msra.mxu0 %v353_v27  ;;  %382 = vmatpush3.bf16.msra.mxu1 %v353_v27  ;;  %v36_v63 = vld [vmem:[%s615_s0 + $0xb0] sm:$0xff]  ;;  %v39_v1 = vld [vmem:[%s615_s0 + $0xc8] sm:$0xff]  ;;  %v22_v2 = vld [vmem:[%s615_s0 + $0x40] sm:$0xff] }
  0x12   :  { %356 = vmatprep.subr.bf16.mxu0 %v355_v28  ;;  %375 = vmatprep.subr.bf16.mxu1 %v355_v28  ;;  %v38_v3 = vld [vmem:[%s615_s0 + $0xc0] sm:$0xff]  ;;  %v25_v4 = vld [vmem:[%s615_s0 + $0x58] sm:$0xff]  ;;  %v24_v6 = vld [vmem:[%s615_s0 + $0x50] sm:$0xff] }
  0x13   :  { %v41_v5 = vld [vmem:[%s615_s0 + $0xd8] sm:$0xff]  ;;  %v40_v7 = vld [vmem:[%s615_s0 + $0xd0] sm:$0xff]  ;;  %v27_v8 = vld [vmem:[%s615_s0 + $0x68] sm:$0xff] }
  0x14   :  { %v43_v9 = vld [vmem:[%s615_s0 + $0xe8] sm:$0xff]  ;;  %v26_v10 = vld [vmem:[%s615_s0 + $0x60] sm:$0xff]  ;;  %v29_v12 = vld [vmem:[%s615_s0 + $0x78] sm:$0xff] }
  0x15   :  { %358 = vmatpush3.bf16.msra.mxu0 %v357_v33  ;;  %383 = vmatpush3.bf16.msra.mxu1 %v357_v33  ;;  %v42_v11 = vld [vmem:[%s615_s0 + $0xe0] sm:$0xff]  ;;  %v45_v13 = vld [vmem:[%s615_s0 + $0xf8] sm:$0xff]  ;;  %v28_v14 = vld [vmem:[%s615_s0 + $0x70] sm:$0xff] }
  0x16   :  { %360 = vmatprep.subr.bf16.mxu0 %v359_v34  ;;  %376 = vmatprep.subr.bf16.mxu1 %v359_v34  ;;  %v44_v15 = vld [vmem:[%s615_s0 + $0xf0] sm:$0xff] }
  0x19   :  { %362 = vmatpush3.bf16.msra.mxu0 %v361_v39  ;;  %384 = vmatpush3.bf16.msra.mxu1 %v361_v39 }
  0x1a   :  { %364 = vmatprep.subr.bf16.mxu0 %v363_v40  ;;  %377 = vmatprep.subr.bf16.mxu1 %v363_v40 }
  0x1d   :  { %366 = vmatpush3.bf16.msra.mxu0 %v365_v45  ;;  %385 = vmatpush3.bf16.msra.mxu1 %v365_v45 }
  0x1e   :  { %368 = vmatprep.subr.bf16.mxu0 %v367_v46  ;;  %378 = vmatprep.subr.bf16.mxu1 %v367_v46 }
  0x21   :  { %370 = vmatpush3.bf16.msra.mxu0 %v369_v49  ;;  %386 = vmatpush3.bf16.msra.mxu1 %v369_v49 }
  0x24   :  { %143 = vmatmul.mubr.f32.vlgmr.msra.gmra.mrb[0].mxu0 %v14_v50  ;;  %183 = vmatmul.mubr.f32.vlgmr.msra.gmra.mrb[0].mxu1 %v30_v51  ;;  %v258_v50 = vld [vmem:[%s616_s2] ss:$0 sm:$0xff] }
  0x25   :  { %147 = vmatprep.mubr.f32.mxu0 %v17_v52  ;;  %187 = vmatprep.mubr.f32.mxu1 %v33_v53 }
  0x28   :  { %148 = vmatmul.mubr.f32.gmra.mrb[2].mxu0 %v16_v54  ;;  %188 = vmatmul.mubr.f32.gmra.mrb[2].mxu1 %v32_v55 }
  0x29   :  { %152 = vmatprep.mubr.f32.mxu0 %v19_v56  ;;  %192 = vmatprep.mubr.f32.mxu1 %v35_v57 }
  0x2c   :  { %153 = vmatmul.mubr.f32.gmra.mrb[4].mxu0 %v18_v58  ;;  %193 = vmatmul.mubr.f32.gmra.mrb[4].mxu1 %v34_v59 }
  0x2d   :  { %157 = vmatprep.mubr.f32.mxu0 %v21_v60  ;;  %197 = vmatprep.mubr.f32.mxu1 %v37_v61 }
  0x30   :  { %158 = vmatmul.mubr.f32.gmra.mrb[6].mxu0 %v20_v62  ;;  %198 = vmatmul.mubr.f32.gmra.mrb[6].mxu1 %v36_v63 }
  0x31   :  { %162 = vmatprep.mubr.f32.mxu0 %v23_v0  ;;  %202 = vmatprep.mubr.f32.mxu1 %v39_v1 }
  0x34   :  { %163 = vmatmul.mubr.f32.gmra.mrb[8].mxu0 %v22_v2  ;;  %203 = vmatmul.mubr.f32.gmra.mrb[8].mxu1 %v38_v3 }
  0x35   :  { %167 = vmatprep.mubr.f32.mxu0 %v25_v4  ;;  %207 = vmatprep.mubr.f32.mxu1 %v41_v5 }
  0x38   :  { %168 = vmatmul.mubr.f32.gmra.mrb[10].mxu0 %v24_v6  ;;  %208 = vmatmul.mubr.f32.gmra.mrb[10].mxu1 %v40_v7 }
  0x39   :  { %172 = vmatprep.mubr.f32.mxu0 %v27_v8  ;;  %212 = vmatprep.mubr.f32.mxu1 %v43_v9 }
  0x3c   :  { %173 = vmatmul.mubr.f32.gmra.mrb[12].mxu0 %v26_v10  ;;  %213 = vmatmul.mubr.f32.gmra.mrb[12].mxu1 %v42_v11 }
  0x3d   :  { %177 = vmatprep.mubr.f32.mxu0 %v29_v12  ;;  %217 = vmatprep.mubr.f32.mxu1 %v45_v13 }
  0x40   :  { %178 = vmatmul.mubr.f32.gmra.mrb[14].mxu0 %v28_v14  ;;  %218 = vmatmul.mubr.f32.gmra.mrb[14].mxu1 %v44_v15 }
  0xf7   :  { %v291_v16 = vpop.f32.mrb[0].mxu0  ;;  %v315_v17 = vpop.f32.mrb[0].mxu1 }
  0xf8   :  { %v292_v18 = vpop.f32.mrb[1].mxu0  ;;  %v316_v19 = vpop.f32.mrb[1].mxu1 }
  0xf9   :  { %v293_v20 = vadd.f32 %v292_v18, %v291_v16  ;;  %v317_v21 = vadd.f32 %v316_v19, %v315_v17 }
  0xfb   :  { %v294_v22 = vpop.f32.mrb[2].mxu0  ;;  %v318_v23 = vpop.f32.mrb[2].mxu1 }
  0xfc   :  { %v295_v24 = vpop.f32.mrb[3].mxu0  ;;  %v319_v25 = vpop.f32.mrb[3].mxu1 }
  0xfd   :  { %v296_v26 = vadd.f32 %v295_v24, %v294_v22  ;;  %v320_v27 = vadd.f32 %v319_v25, %v318_v23 }
  0xff   :  { %v297_v28 = vpop.f32.mrb[4].mxu0  ;;  %v321_v29 = vpop.f32.mrb[4].mxu1 }
 0x100   :  { %v298_v30 = vpop.f32.mrb[5].mxu0  ;;  %v322_v31 = vpop.f32.mrb[5].mxu1 }
 0x101   :  { %v299_v32 = vadd.f32 %v298_v30, %v297_v28  ;;  %v323_v33 = vadd.f32 %v322_v31, %v321_v29 }
 0x103   :  { %v300_v34 = vpop.f32.mrb[6].mxu0  ;;  %v324_v35 = vpop.f32.mrb[6].mxu1 }
 0x104   :  { %v301_v36 = vpop.f32.mrb[7].mxu0  ;;  %v325_v37 = vpop.f32.mrb[7].mxu1 }
 0x105   :  { %v302_v38 = vadd.f32 %v301_v36, %v300_v34  ;;  %v326_v39 = vadd.f32 %v325_v37, %v324_v35 }
 0x107   :  { %v303_v40 = vpop.f32.mrb[8].mxu0  ;;  %v327_v41 = vpop.f32.mrb[8].mxu1 }
 0x108   :  { %v304_v42 = vpop.f32.mrb[9].mxu0  ;;  %v328_v43 = vpop.f32.mrb[9].mxu1 }
 0x109   :  { %v305_v44 = vadd.f32 %v304_v42, %v303_v40  ;;  %v329_v45 = vadd.f32 %v328_v43, %v327_v41 }
 0x10b   :  { %v223_v46 = vmax.f32 %v293_v20, %v305_v44  ;;  %v227_v47 = vmax.f32 %v317_v21, %v329_v45  ;;  %v306_v48 = vpop.f32.mrb[10].mxu0  ;;  %v330_v49 = vpop.f32.mrb[10].mxu1 }
 0x10c   :  { %v307_v51 = vpop.f32.mrb[11].mxu0  ;;  %v331_v52 = vpop.f32.mrb[11].mxu1 }
 0x10d   :  { %v231_v53 = vmax.f32 %v223_v46, %v227_v47  ;;  %v308_v54 = vadd.f32 %v307_v51, %v306_v48  ;;  %v332_v55 = vadd.f32 %v331_v52, %v330_v49 }
 0x10f   :  { %v242_v56 = vadd.f32 %v258_v50, %v231_v53  ;;  %v224_v57 = vmax.f32 %v296_v26, %v308_v54  ;;  %v228_v58 = vmax.f32 %v320_v27, %v332_v55  ;;  %v309_v59 = vpop.f32.mrb[12].mxu0  ;;  %v333_v60 = vpop.f32.mrb[12].mxu1 }
 0x110   :  { %v310_v61 = vpop.f32.mrb[13].mxu0  ;;  %v334_v62 = vpop.f32.mrb[13].mxu1 }
 0x111   :  { %v246_v63 = vmax.f32 %v242_v56, 0.0  ;;  %v232_v0 = vmax.f32 %v224_v57, %v228_v58  ;;  %v311_v1 = vadd.f32 %v310_v61, %v309_v59  ;;  %v335_v2 = vadd.f32 %v334_v62, %v333_v60 }
 0x113   :  { %250 = vst [vmem:[%s617_s3] sm:$0xff] %v246_v63  ;;  %v243_v3 = vadd.f32 %v258_v50, %v232_v0  ;;  %v225_v4 = vmax.f32 %v299_v32, %v311_v1  ;;  %v229_v5 = vmax.f32 %v323_v33, %v335_v2  ;;  %v312_v6 = vpop.f32.mrb[14].mxu0  ;;  %v336_v7 = vpop.f32.mrb[14].mxu1 }
 0x114   :  { %v313_v8 = vpop.f32.mrb[15].mxu0  ;;  %v337_v9 = vpop.f32.mrb[15].mxu1 }
 0x115   :  { %v247_v10 = vmax.f32 %v243_v3, 0.0  ;;  %v233_v11 = vmax.f32 %v225_v4, %v229_v5  ;;  %v314_v12 = vadd.f32 %v313_v8, %v312_v6  ;;  %v338_v13 = vadd.f32 %v337_v9, %v336_v7 }
 0x117   :  { %251 = vst [vmem:[%s617_s3 + $0x8] sm:$0xff] %v247_v10  ;;  %v244_v14 = vadd.f32 %v258_v50, %v233_v11  ;;  %v226_v15 = vmax.f32 %v302_v38, %v314_v12  ;;  %v230_v16 = vmax.f32 %v326_v39, %v338_v13 }
 0x119   :  { %v248_v17 = vmax.f32 %v244_v14, 0.0  ;;  %v234_v18 = vmax.f32 %v226_v15, %v230_v16 }
 0x11b   :  { %252 = vst [vmem:[%s617_s3 + $0x10] sm:$0xff] %v248_v17  ;;  %v245_v19 = vadd.f32 %v258_v50, %v234_v18 }
 0x11d   :  { %v249_v20 = vmax.f32 %v245_v19, 0.0 }
 0x11f   :  { %253 = vst [vmem:[%s617_s3 + $0x18] sm:$0xff] %v249_v20 }

// kernel: net_forward.5
= control target key start
LH: loop header
LB: loop body
LE: loop exit
PB: predicated region body
PF: predicated region fallthrough
CT: control target
= control target key end

     0   :  { %v325_v3 = vmov 0.0|0.0   ;;  %vm326_vm0 = vmmov 0   ;;  %v327_v4 = vmov 0.0   ;;  %vm64_vm1 = vcmask 523264   ;;  %s487_s1 = inlined_call_operand.vmem [shape: f32[320,128], index: 1, kind: input, shape index: {}]   ;;  %s488_s0 = inlined_call_operand.vmem [shape: f32[8,320], index: 0, kind: input, shape index: {}]   ;;  %s489_s2 = inlined_call_operand.vmem [shape: f32[1,128], index: 2, kind: input, shape index: {}]   ;;  %s490_s3 = inlined_call_operand.vmem [shape: f32[8,128], index: 3, kind: output, shape index: {}]  }
   0x1   :  { %v33_v0 = vld [vmem:[%s487_s1 + $0x80] sm:$0xff]  ;;  %v34_v1 = vld [vmem:[%s487_s1 + $0x88] sm:$0xff]  ;;  %310 = vmatprep.subr.bf16.mxu1 %v325_v3  ;;  %275 = vmatprep.mubr.msk.f32.mxu1 %vm326_vm0, %v327_v4  ;;  %v35_v7 = vld [vmem:[%s487_s1 + $0x90] sm:$0xff] }
   0x2   :  { %v17_v2 = vld [vmem:[%s487_s1] sm:$0xff]  ;;  %v278_v5 = vpack.c.bf16 %v34_v1, %v33_v0  ;;  %v18_v6 = vld [vmem:[%s487_s1 + $0x8] sm:$0xff]  ;;  %v36_v8 = vld [vmem:[%s487_s1 + $0x98] sm:$0xff] }
   0x3   :  { %v280_v9 = vpack.c.bf16 %v18_v6, %v17_v2  ;;  %v282_v10 = vpack.c.bf16 %v36_v8, %v35_v7  ;;  %v19_v11 = vld [vmem:[%s487_s1 + $0x10] sm:$0xff]  ;;  %v20_v12 = vld [vmem:[%s487_s1 + $0x18] sm:$0xff]  ;;  %v37_v13 = vld [vmem:[%s487_s1 + $0xa0] sm:$0xff] }
   0x4   :  { %279 = vmatprep.subr.bf16.mxu0 %v278_v5  ;;  %v38_v14 = vld [vmem:[%s487_s1 + $0xa8] sm:$0xff]  ;;  %v284_v15 = vpack.c.bf16 %v20_v12, %v19_v11  ;;  %v21_v17 = vld [vmem:[%s487_s1 + $0x20] sm:$0xff]  ;;  %v39_v19 = vld [vmem:[%s487_s1 + $0xb0] sm:$0xff] }
   0x5   :  { %281 = vmatpush3.bf16.msra.mxu0 %v280_v9  ;;  %v286_v16 = vpack.c.bf16 %v38_v14, %v37_v13  ;;  %v22_v18 = vld [vmem:[%s487_s1 + $0x28] sm:$0xff]  ;;  %v40_v20 = vld [vmem:[%s487_s1 + $0xb8] sm:$0xff]  ;;  %v49_v22 = vld [vmem:[%s487_s1 + $0x100] sm:$0xff] }
   0x6   :  { %283 = vmatprep.subr.bf16.mxu0 %v282_v10  ;;  %v288_v21 = vpack.c.bf16 %v22_v18, %v21_v17  ;;  %v50_v23 = vld [vmem:[%s487_s1 + $0x108] sm:$0xff]  ;;  %v290_v24 = vpack.c.bf16 %v40_v20, %v39_v19  ;;  %v23_v25 = vld [vmem:[%s487_s1 + $0x30] sm:$0xff]  ;;  %v24_v26 = vld [vmem:[%s487_s1 + $0x38] sm:$0xff] }
   0x7   :  { %v41_v27 = vld [vmem:[%s487_s1 + $0xc0] sm:$0xff]  ;;  %v311_v28 = vpack.c.bf16 %v50_v23, %v49_v22  ;;  %v42_v29 = vld [vmem:[%s487_s1 + $0xc8] sm:$0xff]  ;;  %v51_v30 = vld [vmem:[%s487_s1 + $0x110] sm:$0xff]  ;;  %v292_v33 = vpack.c.bf16 %v24_v26, %v23_v25 }
   0x8   :  { %v52_v31 = vld [vmem:[%s487_s1 + $0x118] sm:$0xff]  ;;  %v53_v34 = vld [vmem:[%s487_s1 + $0x120] sm:$0xff]  ;;  %v54_v35 = vld [vmem:[%s487_s1 + $0x128] sm:$0xff]  ;;  %v294_v37 = vpack.c.bf16 %v42_v29, %v41_v27 }
   0x9   :  { %285 = vmatpush3.bf16.msra.mxu0 %v284_v15  ;;  %312 = vmatpush3.bf16.msra.mxu1 %v311_v28  ;;  %v314_v32 = vpack.c.bf16 %v52_v31, %v51_v30  ;;  %v15_v36 = vld [vmem:[%s488_s0 + $0x8] sm:$0xff]  ;;  %v25_v38 = vld [vmem:[%s487_s1 + $0x40] sm:$0xff]  ;;  %v43_v40 = vld [vmem:[%s487_s1 + $0xd0] sm:$0xff]  ;;  %v317_v42 = vpack.c.bf16 %v54_v35, %v53_v34 }
   0xa   :  { %287 = vmatprep.subr.bf16.mxu0 %v286_v16  ;;  %313 = vmatprep.subr.bf16.mxu1 %v325_v3  ;;  %v26_v39 = vld [vmem:[%s487_s1 + $0x48] sm:$0xff]  ;;  %v44_v41 = vld [vmem:[%s487_s1 + $0xd8] sm:$0xff]  ;;  %v55_v44 = vld [vmem:[%s487_s1 + $0x130] sm:$0xff] }
   0xb   :  { %132 = vmatprep.mubr.f32.mxu0 %v15_v36  ;;  %v296_v43 = vpack.c.bf16 %v26_v39, %v25_v38  ;;  %v56_v45 = vld [vmem:[%s487_s1 + $0x138] sm:$0xff]  ;;  %v298_v46 = vpack.c.bf16 %v44_v41, %v43_v40  ;;  %v27_v47 = vld [vmem:[%s487_s1 + $0x50] sm:$0xff]  ;;  %v45_v49 = vld [vmem:[%s487_s1 + $0xe0] sm:$0xff] }
   0xc   :  { %v28_v48 = vld [vmem:[%s487_s1 + $0x58] sm:$0xff]  ;;  %v46_v50 = vld [vmem:[%s487_s1 + $0xe8] sm:$0xff]  ;;  %v320_v51 = vpack.c.bf16 %v56_v45, %v55_v44  ;;  %v29_v54 = vld [vmem:[%s487_s1 + $0x60] sm:$0xff] }
   0xd   :  { %289 = vmatpush3.bf16.msra.mxu0 %v288_v21  ;;  %315 = vmatpush3.bf16.msra.mxu1 %v314_v32  ;;  %v300_v52 = vpack.c.bf16 %v28_v48, %v27_v47  ;;  %v302_v53 = vpack.c.bf16 %v46_v50, %v45_v49  ;;  %v30_v55 = vld [vmem:[%s487_s1 + $0x68] sm:$0xff]  ;;  %v47_v56 = vld [vmem:[%s487_s1 + $0xf0] sm:$0xff]  ;;  %v48_v57 = vld [vmem:[%s487_s1 + $0xf8] sm:$0xff] }
   0xe   :  { %291 = vmatprep.subr.bf16.mxu0 %v290_v24  ;;  %316 = vmatprep.subr.bf16.mxu1 %v325_v3  ;;  %v16_v58 = vld [vmem:[%s488_s0 + $0x10] sm:$0xff]  ;;  %v304_v59 = vpack.c.bf16 %v30_v55, %v29_v54  ;;  %v306_v60 = vpack.c.bf16 %v48_v57, %v47_v56  ;;  %v32_v62 = vld [vmem:[%s487_s1 + $0x78] sm:$0xff]  ;;  %v14_v0 = vld [vmem:[%s488_s0] sm:$0xff] }
   0xf   :  { %v31_v61 = vld [vmem:[%s487_s1 + $0x70] sm:$0xff]  ;;  %v213_v5 = vld [vmem:[%s489_s2] ss:$0 sm:$0xff] }
  0x10   :  { %v308_v63 = vpack.c.bf16 %v32_v62, %v31_v61 }
  0x11   :  { %293 = vmatpush3.bf16.msra.mxu0 %v292_v33  ;;  %318 = vmatpush3.bf16.msra.mxu1 %v317_v42 }
  0x12   :  { %295 = vmatprep.subr.bf16.mxu0 %v294_v37  ;;  %319 = vmatprep.subr.bf16.mxu1 %v325_v3 }
  0x15   :  { %297 = vmatpush3.bf16.msra.mxu0 %v296_v43  ;;  %321 = vmatpush3.bf16.msra.mxu1 %v320_v51 }
  0x16   :  { %299 = vmatprep.subr.bf16.mxu0 %v298_v46 }
  0x18   :  { %276 = vmatmul.mubr.msk.f32.vlgmr.msra.gmra.mrb[0].mxu1 %vm64_vm1, %v16_v58 }
  0x19   :  { %301 = vmatpush3.bf16.msra.mxu0 %v300_v52 }
  0x1a   :  { %303 = vmatprep.subr.bf16.mxu0 %v302_v53 }
  0x1d   :  { %305 = vmatpush3.bf16.msra.mxu0 %v304_v59 }
  0x1e   :  { %307 = vmatprep.subr.bf16.mxu0 %v306_v60 }
  0x21   :  { %309 = vmatpush3.bf16.msra.mxu0 %v308_v63 }
  0x24   :  { %133 = vmatmul.mubr.f32.vlgmr.msra.gmra.mrb[0].mxu0 %v14_v0 }
  0xeb   :  { %v204_v1 = vpop.f32.mrb[0].mxu1 }
  0xec   :  { %v277_v2 = vpop.f32.mrb[1].mxu1 }
  0xf7   :  { %v247_v3 = vpop.f32.mrb[0].mxu0 }
  0xf8   :  { %v248_v4 = vpop.f32.mrb[1].mxu0 }
  0xf9   :  { %v249_v6 = vadd.f32 %v248_v4, %v247_v3 }
  0xfb   :  { %v135_v7 = vadd.f32 %v249_v6, %v213_v5 }
  0xfd   :  { %v205_v8 = vadd.f32 %v204_v1, %v135_v7 }
  0xff   :  { %208 = vst [vmem:[%s490_s3] sm:$0xff] %v205_v8 }

</bundles_post_ra>
